<compile_context>
chip_gen: v7x
topology: tpu7x:2x2x1
jax: 0.10.0
libtpu: 0.0.40
codegen_flags: <defaults>
</compile_context>

<pallas_src>
import functools

import jax
import jax.numpy as jnp
from jax.experimental import pallas as pl
from jax.experimental.pallas import tpu as pltpu


# ----------------------------------------------------------------------------
# Pallas kernel: fused bf16 MXU matmul + f32 bias + activation
# ----------------------------------------------------------------------------
def _ru(x, m):
    return (x + m - 1) // m * m


def _pick_tm(m_rows):
    """Largest M tile (<=512) that still leaves >=2 grid steps (v7x megacore)."""
    mp = _ru(m_rows, 128)
    if mp < 256:
        return mp
    return min(512, (mp // 2) // 128 * 128)


def _matmul_bias_act(patches, w_mat, bias, act):
    """act((patches @ w_mat) + bias).

    patches (M, K) and w_mat (K, Co) are cast to bf16 for the MXU; the
    accumulation, bias add and activation run in f32; output is stored bf16.
    act in {'none', 'relu', 'leaky_relu', 'sigmoid'}.
    """
    M, K = patches.shape
    K2, Co = w_mat.shape
    assert K == K2
    TN = 128
    TM = _pick_tm(M)
    Mp, Kp, Cop = _ru(M, TM), _ru(K, 128), _ru(Co, TN)

    p = patches.astype(jnp.bfloat16)
    w = w_mat.astype(jnp.bfloat16)
    b = bias.astype(jnp.float32).reshape(1, Co)
    if (Mp, Kp) != (M, K):
        p = jnp.pad(p, ((0, Mp - M), (0, Kp - K)))
    if (Kp, Cop) != (K, Co):
        w = jnp.pad(w, ((0, Kp - K), (0, Cop - Co)))
    if Cop != Co:
        b = jnp.pad(b, ((0, 0), (0, Cop - Co)))

    def kernel(p_ref, w_ref, b_ref, o_ref):
        acc = jnp.dot(p_ref[...], w_ref[...], preferred_element_type=jnp.float32)
        acc = acc + b_ref[...]
        if act == "relu":
            acc = jnp.maximum(acc, 0.0)
        elif act == "leaky_relu":          # PyTorch default negative_slope = 0.01
            acc = jnp.where(acc >= 0.0, acc, 0.01 * acc)
        elif act == "sigmoid":
            acc = jax.nn.sigmoid(acc)
        o_ref[...] = acc.astype(o_ref.dtype)

    out = pl.pallas_call(
        kernel,
        out_shape=jax.ShapeDtypeStruct((Mp, Cop), jnp.bfloat16),
        grid_spec=pltpu.PrefetchScalarGridSpec(
            num_scalar_prefetch=0,
            grid=(Mp // TM, Cop // TN),
            in_specs=[
                pl.BlockSpec((TM, Kp), lambda i, j: (i, 0)),
                pl.BlockSpec((Kp, TN), lambda i, j: (0, j)),
                pl.BlockSpec((1, TN), lambda i, j: (0, j)),
            ],
            out_specs=pl.BlockSpec((TM, TN), lambda i, j: (i, j)),
        ),
        compiler_params=pltpu.CompilerParams(
            dimension_semantics=("parallel", "parallel")),
    )(p, w, b)
    return out[:M, :Co]


# ----------------------------------------------------------------------------
# ConvTranspose2d(k=4, stride=2, padding=1): 4-phase sub-pixel decomposition
# ----------------------------------------------------------------------------
#   y[2q+rh, 2p+rw] = sum_{dy,dx in {0,1}} x_pad[q+rh+dy, p+rw+dx] * w[kh, kw]
#   with x_pad = x zero-padded by 1,  kh = (3 if rh==0 else 2) - 2*dy,
#                                     kw = (3 if rw==0 else 2) - 2*dx.
# All 4 phases share one patch matrix (2x2 windows over x_pad, K = 4*Cin) and
# are fused into one matmul by concatenating the phase weights along the
# output-channel axis (N = 4*Cout); the phases are interleaved afterwards.

_KTAB = ((3, 1), (2, 0))   # [phase parity][d] -> kernel tap index


def _deconv_patches(x_nhwc):
    """(N,H,W,C) -> (N, H+1, W+1, 4*C): 2x2 windows of the 1-padded input."""
    n, h, w, c = x_nhwc.shape
    xp = jnp.pad(x_nhwc, ((0, 0), (1, 1), (1, 1), (0, 0)))
    a, b = h + 1, w + 1
    parts = [xp[:, dy:dy + a, dx:dx + b, :] for dy in range(2) for dx in range(2)]
    return jnp.concatenate(parts, axis=-1)


def _deconv_weight_matrix(w_iohw):
    """PyTorch ConvTranspose2d weight (Cin,Cout,4,4) -> (4*Cin, 4*Cout)."""
    cols = []
    for rh in range(2):
        for rw in range(2):
            taps = [w_iohw[:, :, _KTAB[rh][dy], _KTAB[rw][dx]]       # (Cin, Cout)
                    for dy in range(2) for dx in range(2)]
            cols.append(jnp.concatenate(taps, axis=0))               # (4*Cin, Cout)
    return jnp.concatenate(cols, axis=1)                             # (4*Cin, 4*Cout)


def _conv_transpose2d_k4_s2_p1(x_nhwc, w_iohw, bias, act):
    n, h, w, c = x_nhwc.shape
    cout = w_iohw.shape[1]
    a, b = h + 1, w + 1
    patches = _deconv_patches(x_nhwc).reshape(n * a * b, 4 * c)
    w_all = _deconv_weight_matrix(w_iohw)
    b_all = jnp.tile(bias, 4)
    out = _matmul_bias_act(patches, w_all, b_all, act)               # (n*a*b, 4*cout)
    out = out.reshape(n, a, b, 4, cout)
    ee = out[:, 0:h, 0:w, 0, :]      # even rows, even cols
    eo = out[:, 0:h, 1:b, 1, :]      # even rows, odd cols
    oe = out[:, 1:a, 0:w, 2, :]      # odd rows,  even cols
    oo = out[:, 1:a, 1:b, 3, :]      # odd rows,  odd cols
    top = jnp.stack([ee, eo], axis=3).reshape(n, h, 2 * w, cout)
    bot = jnp.stack([oe, oo], axis=3).reshape(n, h, 2 * w, cout)
    return jnp.stack([top, bot], axis=2).reshape(n, 2 * h, 2 * w, cout)


# ----------------------------------------------------------------------------
# Plain Conv2d lowering (non-default 'conv' decoder branch)
# ----------------------------------------------------------------------------
def _conv2d_3x3_p1(x_nhwc, w_oihw, bias, act):
    n, h, w, c = x_nhwc.shape
    cout = w_oihw.shape[0]
    xp = jnp.pad(x_nhwc, ((0, 0), (1, 1), (1, 1), (0, 0)))
    parts = [xp[:, dy:dy + h, dx:dx + w, :] for dy in range(3) for dx in range(3)]
    patches = jnp.concatenate(parts, axis=-1).reshape(n * h * w, 9 * c)
    w_mat = jnp.transpose(w_oihw, (2, 3, 1, 0)).reshape(9 * c, cout)
    out = _matmul_bias_act(patches, w_mat, bias, act)
    return out.reshape(n, h, w, cout)


def _conv2d_1x1(x_nhwc, w_oihw, bias, act):
    n, h, w, c = x_nhwc.shape
    cout = w_oihw.shape[0]
    w_mat = w_oihw.reshape(cout, c).T
    out = _matmul_bias_act(x_nhwc.reshape(n * h * w, c), w_mat, bias, act)
    return out.reshape(n, h, w, cout)


# ----------------------------------------------------------------------------
# PowerPointDetector forward
# ----------------------------------------------------------------------------
def powerpoint_detector_forward(x_nchw, params, decoder_type="convtransposed"):
    x = jnp.transpose(x_nchw, (0, 2, 3, 1)).astype(jnp.bfloat16)   # NCHW -> NHWC, bf16
    if decoder_type == "convtransposed":
        d = _conv_transpose2d_k4_s2_p1(x, params["w1"], params["b1"], "leaky_relu")
        d = _conv_transpose2d_k4_s2_p1(d, params["w2"], params["b2"], "leaky_relu")
        d = _conv_transpose2d_k4_s2_p1(d, params["w3"], params["b3"], "sigmoid")
        # (PyTorch forward also builds zp = torch.ones_like(decoded) and discards it.)
        return jnp.transpose(d, (0, 3, 1, 2)).astype(jnp.float32)
    # non-default branch: Conv2d(Cin, mid, 3,1,1) -> ReLU -> Conv2d(mid, 65, 1,1,0)
    s = _conv2d_3x3_p1(x, params["cw1"], params["cb1"], "relu")
    s = _conv2d_1x1(s, params["cw2"], params["cb2"], "none")
    return jnp.transpose(s, (0, 3, 1, 2)).astype(jnp.float32)


# ----------------------------------------------------------------------------
# Pure-JAX (XLA) references, used only for the numerical self-check in __main__
# ----------------------------------------------------------------------------
def _ref_deconv(x, w_iohw, bias):
    w_flip = jnp.transpose(jnp.flip(w_iohw, (2, 3)), (1, 0, 2, 3))   # (Cout,Cin,4,4)
    y = jax.lax.conv_general_dilated(
        x, w_flip, window_strides=(1, 1), padding=((2, 2), (2, 2)),
        lhs_dilation=(2, 2), dimension_numbers=("NCHW", "OIHW", "NCHW"))
    return y + bias.reshape(1, -1, 1, 1)


def _ref_forward_convtransposed(x, p):
    h = jax.nn.leaky_relu(_ref_deconv(x, p["w1"], p["b1"]))
    h = jax.nn.leaky_relu(_ref_deconv(h, p["w2"], p["b2"]))
    return jax.nn.sigmoid(_ref_deconv(h, p["w3"], p["b3"]))


def _ref_forward_conv(x, p):
    y = jax.lax.conv_general_dilated(
        x, p["cw1"], window_strides=(1, 1), padding=((1, 1), (1, 1)),
        dimension_numbers=("NCHW", "OIHW", "NCHW"))
    y = jax.nn.relu(y + p["cb1"].reshape(1, -1, 1, 1))
    z = jax.lax.conv_general_dilated(
        y, p["cw2"], window_strides=(1, 1), padding=((0, 0), (0, 0)),
        dimension_numbers=("NCHW", "OIHW", "NCHW"))
    return z + p["cb2"].reshape(1, -1, 1, 1)


if __name__ == "__main__":
    key = jax.random.PRNGKey(0)
    ks = jax.random.split(key, 12)

    N, CIN, H, W = 2, 32, 16, 16     # input_channel = 32
    MID = 32                         # mid_channel   = 32

    def winit(k, shape, fan_in):
        return jax.random.normal(k, shape, jnp.float32) / jnp.sqrt(float(fan_in))

    params = {
        # nn.ConvTranspose2d weights, PyTorch layout (Cin, Cout, 4, 4)
        "w1": winit(ks[0], (CIN, MID, 4, 4), CIN * 16),
        "b1": winit(ks[1], (MID,), CIN * 16),
        "w2": winit(ks[2], (MID, MID, 4, 4), MID * 16),
        "b2": winit(ks[3], (MID,), MID * 16),
        "w3": winit(ks[4], (MID, 1, 4, 4), MID * 16),
        "b3": winit(ks[5], (1,), MID * 16),
        # non-default 'conv' decoder branch, PyTorch layout (Cout, Cin, kh, kw)
        "cw1": winit(ks[6], (MID, CIN, 3, 3), CIN * 9),
        "cb1": winit(ks[7], (MID,), CIN * 9),
        "cw2": winit(ks[8], (65, MID, 1, 1), MID),
        "cb2": winit(ks[9], (65,), MID),
    }
    x = jax.random.normal(ks[10], (N, CIN, H, W), jnp.float32)

    # --- default decoder: 'convtransposed' -----------------------------------
    fwd_t = jax.jit(functools.partial(powerpoint_detector_forward,
                                      decoder_type="convtransposed"))
    det = fwd_t(x, params)
    jax.block_until_ready(det)
    assert det.shape == (N, 1, 8 * H, 8 * W), det.shape           # 3x upsample by 2
    assert bool(jnp.all((det >= 0.0) & (det <= 1.0)))             # sigmoid range

    det_ref = jax.jit(_ref_forward_convtransposed)(x, params)
    err_t = float(jnp.max(jnp.abs(det - det_ref)))
    assert err_t < 3e-2, f"convtransposed mismatch vs XLA reference: {err_t}"

    # --- non-default decoder: 'conv' ------------------------------------------
    fwd_c = jax.jit(functools.partial(powerpoint_detector_forward,
                                      decoder_type="conv"))
    out_c = fwd_c(x, params)
    jax.block_until_ready(out_c)
    assert out_c.shape == (N, 65, H, W), out_c.shape

    out_ref = jax.jit(_ref_forward_conv)(x, params)
    err_c = float(jnp.max(jnp.abs(out_c - out_ref)))
    assert err_c < 3e-2, f"conv mismatch vs XLA reference: {err_c}"

    print("KERNEL_OK")
</pallas_src>

<mosaic_0001>
module attributes {stable_mosaic.version = 11 : i64} {
  func.func @kernel(%arg0: i32, %arg1: i32, %arg2: memref<256x128xbf16, #tpu.memory_space<vmem>>, %arg3: memref<128x128xbf16, #tpu.memory_space<vmem>>, %arg4: memref<1x128xf32, #tpu.memory_space<vmem>>, %arg5: memref<256x128xbf16, #tpu.memory_space<vmem>>) attributes {dimension_semantics = [#tpu.dimension_semantics<parallel>, #tpu.dimension_semantics<parallel>], iteration_bounds = array<i64: 3, 1>, scalar_prefetch = 0 : i64, scratch_operands = 0 : i64, tpu.core_type = #tpu.core_type<tc>, window_params = [{transform_indices = @transform_0, window_bounds = array<i64: 256, 128>}, {transform_indices = @transform_1, window_bounds = array<i64: 128, 128>}, {transform_indices = @transform_2, window_bounds = array<i64: 1, 128>}, {transform_indices = @transform_3, window_bounds = array<i64: 256, 128>}]} {
    %c0 = arith.constant 0 : index
    %c0_0 = arith.constant 0 : index
    %0 = vector.load %arg2[%c0, %c0_0] : memref<256x128xbf16, #tpu.memory_space<vmem>>, vector<256x128xbf16>
    %c0_1 = arith.constant 0 : index
    %c0_2 = arith.constant 0 : index
    %1 = vector.load %arg3[%c0_1, %c0_2] : memref<128x128xbf16, #tpu.memory_space<vmem>>, vector<128x128xbf16>
    %cst = arith.constant dense<0.000000e+00> : vector<256x128xf32>
    %2 = tpu.matmul %0, %1, %cst {dimension_numbers = #tpu.dot_dimension_numbers<[1], [0], [0], [1], [0, 0, 1, 1], [], []>} : vector<256x128xbf16>, vector<128x128xbf16>, vector<256x128xf32> -> vector<256x128xf32>
    %c0_3 = arith.constant 0 : index
    %c0_4 = arith.constant 0 : index
    %3 = vector.load %arg4[%c0_3, %c0_4] : memref<1x128xf32, #tpu.memory_space<vmem>>, vector<1x128xf32>
    %4 = vector.broadcast %3 : vector<1x128xf32> to vector<256x128xf32>
    %5 = arith.addf %2, %4 : vector<256x128xf32>
    %cst_5 = arith.constant 0.000000e+00 : f32
    %6 = vector.broadcast %cst_5 : f32 to vector<256x128xf32>
    %7 = arith.cmpf oge, %5, %6 : vector<256x128xf32>
    %cst_6 = arith.constant 0.00999999977 : f32
    %8 = vector.broadcast %cst_6 : f32 to vector<256x128xf32>
    %9 = arith.mulf %8, %5 : vector<256x128xf32>
    %10 = arith.select %7, %5, %9 : vector<256x128xi1>, vector<256x128xf32>
    %11 = arith.truncf %10 : vector<256x128xf32> to vector<256x128xbf16>
    %c0_7 = arith.constant 0 : index
    %c0_8 = arith.constant 0 : index
    %12 = vector.load %arg5[%c0_7, %c0_8] : memref<256x128xbf16, #tpu.memory_space<vmem>>, vector<256x128xbf16>
    tpu.vector_store %arg5[%c0_7, %c0_8], %11 {strides = array<i32>} : memref<256x128xbf16, #tpu.memory_space<vmem>>, vector<256x128xbf16>,
    return
  }
  func.func @transform_0(%arg0: i32, %arg1: i32) -> (i32, i32) {
    %c0_i32 = arith.constant 0 : i32
    %c0_i32_0 = arith.constant 0 : i32
    return %arg0, %c0_i32 : i32, i32
  }
  func.func @transform_1(%arg0: i32, %arg1: i32) -> (i32, i32) {
    %c0_i32 = arith.constant 0 : i32
    %c0_i32_0 = arith.constant 0 : i32
    return %c0_i32, %arg1 : i32, i32
  }
  func.func @transform_2(%arg0: i32, %arg1: i32) -> (i32, i32) {
    %c0_i32 = arith.constant 0 : i32
    %c0_i32_0 = arith.constant 0 : i32
    return %c0_i32, %arg1 : i32, i32
  }
  func.func @transform_3(%arg0: i32, %arg1: i32) -> (i32, i32) {
    %c0_i32 = arith.constant 0 : i32
    return %arg0, %arg1 : i32, i32
  }
}

module attributes {stable_mosaic.version = 11 : i64} {
  func.func @kernel(%arg0: i32, %arg1: i32, %arg2: memref<512x128xbf16, #tpu.memory_space<vmem>>, %arg3: memref<128x128xbf16, #tpu.memory_space<vmem>>, %arg4: memref<1x128xf32, #tpu.memory_space<vmem>>, %arg5: memref<512x128xbf16, #tpu.memory_space<vmem>>) attributes {dimension_semantics = [#tpu.dimension_semantics<parallel>, #tpu.dimension_semantics<parallel>], iteration_bounds = array<i64: 5, 1>, scalar_prefetch = 0 : i64, scratch_operands = 0 : i64, tpu.core_type = #tpu.core_type<tc>, window_params = [{transform_indices = @transform_0, window_bounds = array<i64: 512, 128>}, {transform_indices = @transform_1, window_bounds = array<i64: 128, 128>}, {transform_indices = @transform_2, window_bounds = array<i64: 1, 128>}, {transform_indices = @transform_3, window_bounds = array<i64: 512, 128>}]} {
    %c0 = arith.constant 0 : index
    %c0_0 = arith.constant 0 : index
    %0 = vector.load %arg2[%c0, %c0_0] : memref<512x128xbf16, #tpu.memory_space<vmem>>, vector<512x128xbf16>
    %c0_1 = arith.constant 0 : index
    %c0_2 = arith.constant 0 : index
    %1 = vector.load %arg3[%c0_1, %c0_2] : memref<128x128xbf16, #tpu.memory_space<vmem>>, vector<128x128xbf16>
    %cst = arith.constant dense<0.000000e+00> : vector<512x128xf32>
    %2 = tpu.matmul %0, %1, %cst {dimension_numbers = #tpu.dot_dimension_numbers<[1], [0], [0], [1], [0, 0, 1, 1], [], []>} : vector<512x128xbf16>, vector<128x128xbf16>, vector<512x128xf32> -> vector<512x128xf32>
    %c0_3 = arith.constant 0 : index
    %c0_4 = arith.constant 0 : index
    %3 = vector.load %arg4[%c0_3, %c0_4] : memref<1x128xf32, #tpu.memory_space<vmem>>, vector<1x128xf32>
    %4 = vector.broadcast %3 : vector<1x128xf32> to vector<512x128xf32>
    %5 = arith.addf %2, %4 : vector<512x128xf32>
    %cst_5 = arith.constant 0.000000e+00 : f32
    %6 = vector.broadcast %cst_5 : f32 to vector<512x128xf32>
    %7 = arith.cmpf oge, %5, %6 : vector<512x128xf32>
    %cst_6 = arith.constant 0.00999999977 : f32
    %8 = vector.broadcast %cst_6 : f32 to vector<512x128xf32>
    %9 = arith.mulf %8, %5 : vector<512x128xf32>
    %10 = arith.select %7, %5, %9 : vector<512x128xi1>, vector<512x128xf32>
    %11 = arith.truncf %10 : vector<512x128xf32> to vector<512x128xbf16>
    %c0_7 = arith.constant 0 : index
    %c0_8 = arith.constant 0 : index
    %12 = vector.load %arg5[%c0_7, %c0_8] : memref<512x128xbf16, #tpu.memory_space<vmem>>, vector<512x128xbf16>
    tpu.vector_store %arg5[%c0_7, %c0_8], %11 {strides = array<i32>} : memref<512x128xbf16, #tpu.memory_space<vmem>>, vector<512x128xbf16>,
    return
  }
  func.func @transform_0(%arg0: i32, %arg1: i32) -> (i32, i32) {
    %c0_i32 = arith.constant 0 : i32
    %c0_i32_0 = arith.constant 0 : i32
    return %arg0, %c0_i32 : i32, i32
  }
  func.func @transform_1(%arg0: i32, %arg1: i32) -> (i32, i32) {
    %c0_i32 = arith.constant 0 : i32
    %c0_i32_0 = arith.constant 0 : i32
    return %c0_i32, %arg1 : i32, i32
  }
  func.func @transform_2(%arg0: i32, %arg1: i32) -> (i32, i32) {
    %c0_i32 = arith.constant 0 : i32
    %c0_i32_0 = arith.constant 0 : i32
    return %c0_i32, %arg1 : i32, i32
  }
  func.func @transform_3(%arg0: i32, %arg1: i32) -> (i32, i32) {
    %c0_i32 = arith.constant 0 : i32
    return %arg0, %arg1 : i32, i32
  }
}

module attributes {stable_mosaic.version = 11 : i64} {
  func.func @kernel(%arg0: i32, %arg1: i32, %arg2: memref<512x128xbf16, #tpu.memory_space<vmem>>, %arg3: memref<128x128xbf16, #tpu.memory_space<vmem>>, %arg4: memref<1x128xf32, #tpu.memory_space<vmem>>, %arg5: memref<512x128xbf16, #tpu.memory_space<vmem>>) attributes {dimension_semantics = [#tpu.dimension_semantics<parallel>, #tpu.dimension_semantics<parallel>], iteration_bounds = array<i64: 17, 1>, scalar_prefetch = 0 : i64, scratch_operands = 0 : i64, tpu.core_type = #tpu.core_type<tc>, window_params = [{transform_indices = @transform_0, window_bounds = array<i64: 512, 128>}, {transform_indices = @transform_1, window_bounds = array<i64: 128, 128>}, {transform_indices = @transform_2, window_bounds = array<i64: 1, 128>}, {transform_indices = @transform_3, window_bounds = array<i64: 512, 128>}]} {
    %c0 = arith.constant 0 : index
    %c0_0 = arith.constant 0 : index
    %0 = vector.load %arg2[%c0, %c0_0] : memref<512x128xbf16, #tpu.memory_space<vmem>>, vector<512x128xbf16>
    %c0_1 = arith.constant 0 : index
    %c0_2 = arith.constant 0 : index
    %1 = vector.load %arg3[%c0_1, %c0_2] : memref<128x128xbf16, #tpu.memory_space<vmem>>, vector<128x128xbf16>
    %cst = arith.constant dense<0.000000e+00> : vector<512x128xf32>
    %2 = tpu.matmul %0, %1, %cst {dimension_numbers = #tpu.dot_dimension_numbers<[1], [0], [0], [1], [0, 0, 1, 1], [], []>} : vector<512x128xbf16>, vector<128x128xbf16>, vector<512x128xf32> -> vector<512x128xf32>
    %c0_3 = arith.constant 0 : index
    %c0_4 = arith.constant 0 : index
    %3 = vector.load %arg4[%c0_3, %c0_4] : memref<1x128xf32, #tpu.memory_space<vmem>>, vector<1x128xf32>
    %4 = vector.broadcast %3 : vector<1x128xf32> to vector<512x128xf32>
    %5 = arith.addf %2, %4 : vector<512x128xf32>
    %6 = arith.negf %5 : vector<512x128xf32>
    %7 = math.exp %6 : vector<512x128xf32>
    %cst_5 = arith.constant 1.000000e+00 : f32
    %8 = vector.broadcast %cst_5 : f32 to vector<512x128xf32>
    %9 = arith.addf %8, %7 : vector<512x128xf32>
    %10 = arith.divf %8, %9 : vector<512x128xf32>
    %11 = arith.truncf %10 : vector<512x128xf32> to vector<512x128xbf16>
    %c0_6 = arith.constant 0 : index
    %c0_7 = arith.constant 0 : index
    %12 = vector.load %arg5[%c0_6, %c0_7] : memref<512x128xbf16, #tpu.memory_space<vmem>>, vector<512x128xbf16>
    tpu.vector_store %arg5[%c0_6, %c0_7], %11 {strides = array<i32>} : memref<512x128xbf16, #tpu.memory_space<vmem>>, vector<512x128xbf16>,
    return
  }
  func.func @transform_0(%arg0: i32, %arg1: i32) -> (i32, i32) {
    %c0_i32 = arith.constant 0 : i32
    %c0_i32_0 = arith.constant 0 : i32
    return %arg0, %c0_i32 : i32, i32
  }
  func.func @transform_1(%arg0: i32, %arg1: i32) -> (i32, i32) {
    %c0_i32 = arith.constant 0 : i32
    %c0_i32_0 = arith.constant 0 : i32
    return %c0_i32, %arg1 : i32, i32
  }
  func.func @transform_2(%arg0: i32, %arg1: i32) -> (i32, i32) {
    %c0_i32 = arith.constant 0 : i32
    %c0_i32_0 = arith.constant 0 : i32
    return %c0_i32, %arg1 : i32, i32
  }
  func.func @transform_3(%arg0: i32, %arg1: i32) -> (i32, i32) {
    %c0_i32 = arith.constant 0 : i32
    return %arg0, %arg1 : i32, i32
  }
}

</mosaic_0001>

<bundles_post_ra>
// kernel: tile.18
= control target key start
LH: loop header
LB: loop body
LE: loop exit
PB: predicated region body
PF: predicated region fallthrough
CT: control target
= control target key end

     0   :  { %s22_s0 = inlined_call_operand.vmem [shape: f32[32], index: 0, kind: input, shape index: {}]   ;;  %s23_s1 = inlined_call_operand.vmem [shape: f32[4,32], index: 1, kind: output, shape index: {}]  }
   0x1   :  { %v4_v0 = vld [vmem:[%s22_s0] ss:$0 sm:$0xff] }
   0x2   :  { %5 = vst [vmem:[%s23_s1] sm:$0xf] %v4_v0 }

// kernel: tile.19
= control target key start
LH: loop header
LB: loop body
LE: loop exit
PB: predicated region body
PF: predicated region fallthrough
CT: control target
= control target key end

     0   :  { %vm7_vm0 = vcmask 261120   ;;  %s37_s8 = smov 32   ;;  %s38_s9 = smov 64   ;;  %vm13_vm1 = vcmask 1048320   ;;  %vm19_vm2 = vcmask 785920   ;;  %vm25_vm3 = vcmask 523520   ;;  %s55_s0 = inlined_call_operand.vmem [shape: f32[4,32], index: 0, kind: input, shape index: {}]   ;;  %s56_s1 = inlined_call_operand.vmem [shape: f32[1,128], index: 1, kind: output, shape index: {}]  }
   0x1   :  { %v4_v0 = vld [vmem:[%s55_s0] sm:$0xf]  ;;  %s36_s0 = smov 96  }
   0x2   :  { %5 = vst [vmem:[#allocation1] sm:$0xf] %v4_v0 }
   0x9   :  { %v10_v1 = vld [vmem:[#allocation1 + $0x3] sm:$0x1]   ;;  %v22_v2 = vld [vmem:[#allocation1 + $0x1] sm:$0x1]   ;;  %v6_v3 = vld [vmem:[#allocation1] sm:$0x1]  }
   0xa   :  { %11 = vrot.lane.b32.xlu0 %v10_v1, %s36_s0  ;;  %23 = vrot.lane.b32.xlu1 %v22_v2, %s37_s8  ;;  %v16_v4 = vld [vmem:[#allocation1 + $0x2] sm:$0x1]   ;;  %8 = vst.msk [vmem:[#allocation0] sm:$0x1] %vm7_vm0, %v6_v3  }
   0xe   :  { %17 = vrot.lane.b32.xlu0 %v16_v4, %s38_s9 }
  0x7c   :  { %v12_v5 = vpop.permute.xlu0 %11   ;;  %v24_v6 = vpop.permute.xlu1 %23  }
  0x7d   :  { %14 = vst.msk [vmem:[#allocation0] sm:$0x1] %vm13_vm1, %v12_v5  }
  0x80   :  { %v18_v7 = vpop.permute.xlu0 %17  }
  0x81   :  { %20 = vst.msk [vmem:[#allocation0] sm:$0x1] %vm19_vm2, %v18_v7  }
  0x82   :  { %26 = vst.msk [vmem:[#allocation0] sm:$0x1] %vm25_vm3, %v24_v6  }
  0x89   :  { %v30_v8 = vld [vmem:[#allocation0] sm:$0x1] }
  0x8a   :  { %32 = vst [vmem:[%s56_s1] sm:$0x1] %v30_v8 }

// kernel: powerpoint_detector_forward.3
= control target key start
LH: loop header
LB: loop body
LE: loop exit
PB: predicated region body
PF: predicated region fallthrough
CT: control target
= control target key end

     0   :  { %s1321_s12 = smov 0   ;;  %s1323_s13 = smov 0   ;;  %s1464_s0 = inlined_call_operand.vmem [shape: bf16[768,128], index: 0, kind: input, shape index: {}]   ;;  %s1465_s1 = inlined_call_operand.vmem [shape: bf16[128,128], index: 1, kind: input, shape index: {}]   ;;  %s1466_s2 = inlined_call_operand.vmem [shape: f32[1,128], index: 2, kind: input, shape index: {}]   ;;  %s1467_s3 = inlined_call_operand.vmem [shape: bf16[768,128], index: 3, kind: output, shape index: {}]  }
   0x1   :  { %s1325_s14 = smov 0  }
   0x2 LB: > { %s25_s15 = sadd.s32 1, %s1295_s13  ;;  %p950_p0 = scmp.ge.s32.totalorder %s1299_s14, 1  ;;  %s1299_s14 = sphi %s1325_s14, %s13_s14   ;;  %s1295_s13 = sphi %s1323_s13, %s1469_s13   ;;  %s1291_s12 = sphi %s1321_s12, %s1468_s12  }
   0x3   : > { %p27_p1 = scmp.ge.s32.totalorder %s25_s15, 3  ;;  %p169_p2 = scmp.lt.s32.totalorder %s1299_s14, 4 }
   0x5   : > { %s1471_s15 = smov (%p27_p1, %s25_s15), 0  ;;  %p170_p3 = pnand %p950_p0, %p169_p2 }
   0x6   : > { %v1253_v0 = vld [vmem:[%s1465_s1] sm:$0xff] (!%p170_p3)   ;;  %s951_s18 = sshll.u32 (!%p170_p3), %s1291_s12, 5  ;;  %v1254_v1 = vld [vmem:[%s1465_s1 + $0x8] sm:$0xff] (!%p170_p3)   ;;  %v1255_v2 = vld [vmem:[%s1465_s1 + $0x10] sm:$0xff] (!%p170_p3)  }
   0x7   : > { %173 = sbr.rel (%p170_p3) target bundleno = 294 (0x126), region = 32  ;;  %p204_p4 = scmp.lt.s32.totalorder (!%p170_p3), %s951_s18, 95  ;;  %1165 = vmatprep.subr.bf16.mxu0 (!%p170_p3), %v1253_v0  ;;  %1213 = vmatprep.subr.bf16.mxu1 (!%p170_p3), %v1253_v0  ;;  %v1256_v3 = vld [vmem:[%s1465_s1 + $0x18] sm:$0xff] (!%p170_p3)   ;;  %v1257_v6 = vld [vmem:[%s1465_s1 + $0x20] sm:$0xff] (!%p170_p3)   ;;  %v1258_v7 = vld [vmem:[%s1465_s1 + $0x28] sm:$0xff] (!%p170_p3)  }
   0x8   : > { %1166 = vmatpush3.bf16.msra.mxu0 (!%p170_p3), %v1253_v0  ;;  %1221 = vmatpush3.bf16.msra.mxu1 (!%p170_p3), %v1253_v0  ;;  %v1259_v8 = vld [vmem:[%s1465_s1 + $0x30] sm:$0xff] (!%p170_p3)   ;;  %v1260_v9 = vld [vmem:[%s1465_s1 + $0x38] sm:$0xff] (!%p170_p3)   ;;  %v1392_v24 = vld [vmem:[%s1466_s2] ss:$0 sm:$0xff] (!%p170_p3) }
   0x9   : > { %1167 = vmatprep.subr.bf16.mxu0 (!%p170_p3), %v1254_v1  ;;  %1214 = vmatprep.subr.bf16.mxu1 (!%p170_p3), %v1254_v1 }
   0xc   : > { %1168 = vmatpush3.bf16.msra.mxu0 (!%p170_p3), %v1254_v1  ;;  %1222 = vmatpush3.bf16.msra.mxu1 (!%p170_p3), %v1254_v1 }
   0xd   : > { %1169 = vmatprep.subr.bf16.mxu0 (!%p170_p3), %v1255_v2  ;;  %1215 = vmatprep.subr.bf16.mxu1 (!%p170_p3), %v1255_v2 }
   0xe   : > { %s1473_s18 = smov (!%p204_p4, %s951_s18), 95 }
   0xf   : > { %s952_s23 = sshll.u32 %s1473_s18, 2 }
  0x10   : > { %s1356_s26 = scalar_lea.vmem %s1464_s0, %s952_s23  ;;  %1170 = vmatpush3.bf16.msra.mxu0 %v1255_v2  ;;  %1223 = vmatpush3.bf16.msra.mxu1 %v1255_v2  ;;  %s1409_s17 = scalar_lea.vmem %s1467_s3, %s952_s23 }
  0x11   : > { %v1261_v4 = vld [vmem:[%s1356_s26] sm:$0xff]   ;;  %1171 = vmatprep.subr.bf16.mxu0 %v1256_v3  ;;  %1216 = vmatprep.subr.bf16.mxu1 %v1256_v3  ;;  %v1263_v10 = vld [vmem:[%s1356_s26 + $0x8] sm:$0xff]   ;;  %v1265_v12 = vld [vmem:[%s1356_s26 + $0x10] sm:$0xff]  }
  0x12   : > { %v1262_v5 = vld [vmem:[%s1356_s26 + $0x40] sm:$0xff]   ;;  %1181 = vmatprep.mubr.bf16.mxu0 %v1261_v4  ;;  %v1264_v11 = vld [vmem:[%s1356_s26 + $0x48] sm:$0xff]   ;;  %v1266_v13 = vld [vmem:[%s1356_s26 + $0x50] sm:$0xff]  }
  0x13   : > { %1197 = vmatprep.mubr.bf16.mxu1 %v1262_v5  ;;  %v1267_v14 = vld [vmem:[%s1356_s26 + $0x18] sm:$0xff]   ;;  %v1269_v16 = vld [vmem:[%s1356_s26 + $0x20] sm:$0xff]   ;;  %v1271_v18 = vld [vmem:[%s1356_s26 + $0x28] sm:$0xff]  }
  0x14   : > { %1172 = vmatpush3.bf16.msra.mxu0 %v1256_v3  ;;  %1224 = vmatpush3.bf16.msra.mxu1 %v1256_v3  ;;  %v1268_v15 = vld [vmem:[%s1356_s26 + $0x58] sm:$0xff]   ;;  %v1270_v17 = vld [vmem:[%s1356_s26 + $0x60] sm:$0xff]   ;;  %v1272_v19 = vld [vmem:[%s1356_s26 + $0x68] sm:$0xff]  }
  0x15   : > { %1173 = vmatprep.subr.bf16.mxu0 %v1257_v6  ;;  %1217 = vmatprep.subr.bf16.mxu1 %v1257_v6  ;;  %v1273_v20 = vld [vmem:[%s1356_s26 + $0x30] sm:$0xff]   ;;  %v1275_v22 = vld [vmem:[%s1356_s26 + $0x38] sm:$0xff]  }
  0x16   : > { %v1274_v21 = vld [vmem:[%s1356_s26 + $0x70] sm:$0xff]   ;;  %v1276_v23 = vld [vmem:[%s1356_s26 + $0x78] sm:$0xff]  }
  0x18   : > { %1174 = vmatpush3.bf16.msra.mxu0 %v1257_v6  ;;  %1225 = vmatpush3.bf16.msra.mxu1 %v1257_v6 }
  0x19   : > { %1175 = vmatprep.subr.bf16.mxu0 %v1258_v7  ;;  %1218 = vmatprep.subr.bf16.mxu1 %v1258_v7 }
  0x1c   : > { %1176 = vmatpush3.bf16.msra.mxu0 %v1258_v7  ;;  %1226 = vmatpush3.bf16.msra.mxu1 %v1258_v7 }
  0x1d   : > { %1177 = vmatprep.subr.bf16.mxu0 %v1259_v8  ;;  %1219 = vmatprep.subr.bf16.mxu1 %v1259_v8 }
  0x20   : > { %1178 = vmatpush3.bf16.msra.mxu0 %v1259_v8  ;;  %1227 = vmatpush3.bf16.msra.mxu1 %v1259_v8 }
  0x21   : > { %1179 = vmatprep.subr.bf16.mxu0 %v1260_v9  ;;  %1220 = vmatprep.subr.bf16.mxu1 %v1260_v9 }
  0x24   : > { %1180 = vmatpush3.bf16.msra.mxu0 %v1260_v9  ;;  %1228 = vmatpush3.bf16.msra.mxu1 %v1260_v9 }
  0x27   : > { %1182 = vmatmul.mubr.bf16.vlgmr.msra.gmra.mrb[0].mxu0 %v1263_v10  ;;  %1198 = vmatmul.mubr.bf16.vlgmr.msra.gmra.mrb[0].mxu1 %v1264_v11 }
  0x28   : > { %1185 = vmatprep.mubr.bf16.mxu0 %v1265_v12  ;;  %1201 = vmatprep.mubr.bf16.mxu1 %v1266_v13 }
  0x2f   : > { %1186 = vmatmul.mubr.bf16.gmra.mrb[4].mxu0 %v1267_v14  ;;  %1202 = vmatmul.mubr.bf16.gmra.mrb[4].mxu1 %v1268_v15 }
  0x30   : > { %1189 = vmatprep.mubr.bf16.mxu0 %v1269_v16  ;;  %1205 = vmatprep.mubr.bf16.mxu1 %v1270_v17 }
  0x37   : > { %1190 = vmatmul.mubr.bf16.gmra.mrb[8].mxu0 %v1271_v18  ;;  %1206 = vmatmul.mubr.bf16.gmra.mrb[8].mxu1 %v1272_v19 }
  0x38   : > { %1193 = vmatprep.mubr.bf16.mxu0 %v1273_v20  ;;  %1209 = vmatprep.mubr.bf16.mxu1 %v1274_v21 }
  0x3f   : > { %1194 = vmatmul.mubr.bf16.gmra.mrb[12].mxu0 %v1275_v22  ;;  %1210 = vmatmul.mubr.bf16.gmra.mrb[12].mxu1 %v1276_v23 }
  0xfa   : > { %v1183_v25 = vpop.f32.mrb[0].mxu0  ;;  %v1199_v26 = vpop.f32.mrb[0].mxu1 }
  0xfb   : > { %v468_v27 = vadd.f32 %v1183_v25, %v1392_v24  ;;  %v532_v28 = vadd.f32 %v1199_v26, %v1392_v24  ;;  %v459_v29 = vpop.f32.mrb[1].mxu0  ;;  %v523_v30 = vpop.f32.mrb[1].mxu1 }
  0xfc   : > { %v460_v31 = vadd.f32 %v1392_v24, %v459_v29  ;;  %v524_v32 = vadd.f32 %v1392_v24, %v523_v30  ;;  %v1184_v33 = vpop.f32.mrb[2].mxu0  ;;  %v1200_v34 = vpop.f32.mrb[2].mxu1 }
  0xfd   : > { %vm588_vm0 = vcmp.ge.f32.partialorder %v468_v27, 0.0  ;;  %v620_v35 = vmul.f32 0.01, %v468_v27  ;;  %vm604_vm1 = vcmp.ge.f32.partialorder %v532_v28, 0.0  ;;  %v636_v36 = vmul.f32 0.01, %v532_v28 }
  0xfe   : > { %vm586_vm2 = vcmp.ge.f32.partialorder %v460_v31, 0.0  ;;  %v618_v37 = vmul.f32 0.01, %v460_v31  ;;  %vm602_vm3 = vcmp.ge.f32.partialorder %v524_v32, 0.0  ;;  %v634_v38 = vmul.f32 0.01, %v524_v32 }
  0xff   : > { %v471_v39 = vadd.f32 %v1184_v33, %v1392_v24  ;;  %v535_v40 = vadd.f32 %v1200_v34, %v1392_v24  ;;  %v462_v41 = vpop.f32.mrb[3].mxu0  ;;  %v526_v42 = vpop.f32.mrb[3].mxu1  ;;  %v652_v43 = vsel %vm588_vm0, %v468_v27, %v620_v35  ;;  %v668_v44 = vsel %vm604_vm1, %v532_v28, %v636_v36 }
 0x100   : > { %v463_v45 = vadd.f32 %v1392_v24, %v462_v41  ;;  %v527_v46 = vadd.f32 %v1392_v24, %v526_v42  ;;  %v650_v51 = vsel %vm586_vm2, %v460_v31, %v618_v37  ;;  %v666_v52 = vsel %vm602_vm3, %v524_v32, %v634_v38 }
 0x101   : > { %vm589_vm4 = vcmp.ge.f32.partialorder %v471_v39, 0.0  ;;  %v621_v47 = vmul.f32 0.01, %v471_v39  ;;  %vm605_vm5 = vcmp.ge.f32.partialorder %v535_v40, 0.0  ;;  %v637_v48 = vmul.f32 0.01, %v535_v40 }
 0x102   : > { %vm587_vm6 = vcmp.ge.f32.partialorder %v463_v45, 0.0  ;;  %v619_v49 = vmul.f32 0.01, %v463_v45  ;;  %vm603_vm7 = vcmp.ge.f32.partialorder %v527_v46, 0.0  ;;  %v635_v50 = vmul.f32 0.01, %v527_v46 }
 0x103   : > { %v653_v53 = vsel %vm589_vm4, %v471_v39, %v621_v47  ;;  %v669_v54 = vsel %vm605_vm5, %v535_v40, %v637_v48  ;;  %v1187_v55 = vpop.f32.mrb[4].mxu0  ;;  %v1203_v56 = vpop.f32.mrb[4].mxu1 }
 0x104   : > { %v1054_v57 = vpack.c.bf16 %v653_v53, %v652_v43  ;;  %v1094_v58 = vpack.c.bf16 %v669_v54, %v668_v44  ;;  %v651_v59 = vsel %vm587_vm6, %v463_v45, %v619_v49  ;;  %v667_v60 = vsel %vm603_vm7, %v527_v46, %v635_v50  ;;  %v475_v61 = vpop.f32.mrb[5].mxu0  ;;  %v539_v62 = vpop.f32.mrb[5].mxu1 }
 0x105   : > { %v1049_v63 = vpack.c.bf16 %v651_v59, %v650_v51  ;;  %v1089_v0 = vpack.c.bf16 %v667_v60, %v666_v52  ;;  %v484_v1 = vadd.f32 %v1187_v55, %v1392_v24  ;;  %v548_v2 = vadd.f32 %v1203_v56, %v1392_v24  ;;  %v1188_v3 = vpop.f32.mrb[6].mxu0  ;;  %v1204_v4 = vpop.f32.mrb[6].mxu1 }
 0x106   : > { %1126 = vst [vmem:[%s1409_s17 + $0x8] sm:$0xff] %v1054_v57   ;;  %1134 = vst [vmem:[%s1409_s17 + $0x48] sm:$0xff] %v1094_v58   ;;  %v476_v5 = vadd.f32 %v1392_v24, %v475_v61  ;;  %v540_v6 = vadd.f32 %v1392_v24, %v539_v62  ;;  %v487_v7 = vadd.f32 %v1188_v3, %v1392_v24  ;;  %v478_v9 = vpop.f32.mrb[7].mxu0  ;;  %v542_v10 = vpop.f32.mrb[7].mxu1 }
 0x107   : > { %v551_v8 = vadd.f32 %v1204_v4, %v1392_v24  ;;  %1050 = vst [vmem:[%s1409_s17] sm:$0xff] %v1049_v63   ;;  %1133 = vst [vmem:[%s1409_s17 + $0x40] sm:$0xff] %v1089_v0   ;;  %vm592_vm8 = vcmp.ge.f32.partialorder %v484_v1, 0.0  ;;  %v624_v11 = vmul.f32 0.01, %v484_v1  ;;  %vm608_vm9 = vcmp.ge.f32.partialorder %v548_v2, 0.0 }
 0x108   : > { %v640_v12 = vmul.f32 0.01, %v548_v2  ;;  %vm590_vm10 = vcmp.ge.f32.partialorder %v476_v5, 0.0  ;;  %v622_v13 = vmul.f32 0.01, %v476_v5  ;;  %vm606_vm11 = vcmp.ge.f32.partialorder %v540_v6, 0.0 }
 0x109   : > { %v656_v14 = vsel %vm592_vm8, %v484_v1, %v624_v11  ;;  %v638_v15 = vmul.f32 0.01, %v540_v6  ;;  %vm593_vm12 = vcmp.ge.f32.partialorder %v487_v7, 0.0  ;;  %v625_v16 = vmul.f32 0.01, %v487_v7 }
 0x10a   : > { %v672_v17 = vsel %vm608_vm9, %v548_v2, %v640_v12  ;;  %v654_v18 = vsel %vm590_vm10, %v476_v5, %v622_v13  ;;  %vm609_vm13 = vcmp.ge.f32.partialorder %v551_v8, 0.0  ;;  %v641_v19 = vmul.f32 0.01, %v551_v8  ;;  %v1191_v20 = vpop.f32.mrb[8].mxu0  ;;  %v1207_v21 = vpop.f32.mrb[8].mxu1 }
 0x10b   : > { %v657_v22 = vsel %vm593_vm12, %v487_v7, %v625_v16  ;;  %v479_v23 = vadd.f32 %v1392_v24, %v478_v9  ;;  %v543_v25 = vadd.f32 %v1392_v24, %v542_v10  ;;  %v500_v26 = vadd.f32 %v1191_v20, %v1392_v24  ;;  %v491_v27 = vpop.f32.mrb[9].mxu0  ;;  %v555_v28 = vpop.f32.mrb[9].mxu1 }
 0x10c   : > { %v1064_v29 = vpack.c.bf16 %v657_v22, %v656_v14  ;;  %v673_v30 = vsel %vm609_vm13, %v551_v8, %v641_v19  ;;  %v564_v31 = vadd.f32 %v1207_v21, %v1392_v24  ;;  %v492_v32 = vadd.f32 %v1392_v24, %v491_v27  ;;  %v1192_v33 = vpop.f32.mrb[10].mxu0  ;;  %v1208_v34 = vpop.f32.mrb[10].mxu1 }
 0x10d   : > { %v1104_v35 = vpack.c.bf16 %v673_v30, %v672_v17  ;;  %vm591_vm14 = vcmp.ge.f32.partialorder %v479_v23, 0.0  ;;  %v623_v36 = vmul.f32 0.01, %v479_v23  ;;  %vm607_vm15 = vcmp.ge.f32.partialorder %v543_v25, 0.0  ;;  %v494_v37 = vpop.f32.mrb[11].mxu0  ;;  %v558_v38 = vpop.f32.mrb[11].mxu1 }
 0x10e   : > { %1128 = vst [vmem:[%s1409_s17 + $0x18] sm:$0xff] %v1064_v29   ;;  %v639_v39 = vmul.f32 0.01, %v543_v25  ;;  %vm596_vm0 = vcmp.ge.f32.partialorder %v500_v26, 0.0  ;;  %v628_v40 = vmul.f32 0.01, %v500_v26  ;;  %v670_v41 = vsel %vm606_vm11, %v540_v6, %v638_v15 }
 0x10f   : > { %vm612_vm1 = vcmp.ge.f32.partialorder %v564_v31, 0.0  ;;  %1136 = vst [vmem:[%s1409_s17 + $0x58] sm:$0xff] %v1104_v35   ;;  %v655_v42 = vsel %vm591_vm14, %v479_v23, %v623_v36  ;;  %v644_v43 = vmul.f32 0.01, %v564_v31  ;;  %vm594_vm2 = vcmp.ge.f32.partialorder %v492_v32, 0.0 }
 0x110   : > { %v1059_v44 = vpack.c.bf16 %v655_v42, %v654_v18  ;;  %v671_v45 = vsel %vm607_vm15, %v543_v25, %v639_v39  ;;  %v626_v46 = vmul.f32 0.01, %v492_v32  ;;  %v556_v47 = vadd.f32 %v1392_v24, %v555_v28 }
 0x111   : > { %v1099_v48 = vpack.c.bf16 %v671_v45, %v670_v41  ;;  %v660_v49 = vsel %vm596_vm0, %v500_v26, %v628_v40  ;;  %v676_v50 = vsel %vm612_vm1, %v564_v31, %v644_v43  ;;  %v503_v51 = vadd.f32 %v1192_v33, %v1392_v24 }
 0x112   : > { %1127 = vst [vmem:[%s1409_s17 + $0x10] sm:$0xff] %v1059_v44   ;;  %vm610_vm3 = vcmp.ge.f32.partialorder %v556_v47, 0.0  ;;  %v642_v52 = vmul.f32 0.01, %v556_v47  ;;  %v567_v53 = vadd.f32 %v1208_v34, %v1392_v24  ;;  %v495_v54 = vadd.f32 %v1392_v24, %v494_v37  ;;  %v1195_v55 = vpop.f32.mrb[12].mxu0  ;;  %v1211_v56 = vpop.f32.mrb[12].mxu1 }
 0x113   : > { %1135 = vst [vmem:[%s1409_s17 + $0x50] sm:$0xff] %v1099_v48   ;;  %vm597_vm4 = vcmp.ge.f32.partialorder %v503_v51, 0.0  ;;  %v629_v57 = vmul.f32 0.01, %v503_v51  ;;  %v559_v58 = vadd.f32 %v1392_v24, %v558_v38  ;;  %v516_v59 = vadd.f32 %v1195_v55, %v1392_v24  ;;  %v507_v60 = vpop.f32.mrb[13].mxu0  ;;  %v571_v61 = vpop.f32.mrb[13].mxu1 }
 0x114   : > { %v658_v62 = vsel %vm594_vm2, %v492_v32, %v626_v46  ;;  %vm613_vm5 = vcmp.ge.f32.partialorder %v567_v53, 0.0  ;;  %v645_v63 = vmul.f32 0.01, %v567_v53  ;;  %vm595_vm6 = vcmp.ge.f32.partialorder %v495_v54, 0.0  ;;  %v1196_v0 = vpop.f32.mrb[14].mxu0  ;;  %v1212_v1 = vpop.f32.mrb[14].mxu1 }
 0x115   : > { %v661_v2 = vsel %vm597_vm4, %v503_v51, %v629_v57  ;;  %v627_v3 = vmul.f32 0.01, %v495_v54  ;;  %vm611_vm7 = vcmp.ge.f32.partialorder %v559_v58, 0.0  ;;  %v643_v4 = vmul.f32 0.01, %v559_v58  ;;  %v510_v5 = vpop.f32.mrb[15].mxu0 }
 0x116   : > { %v674_v6 = vsel %vm610_vm3, %v556_v47, %v642_v52  ;;  %v1074_v7 = vpack.c.bf16 %v661_v2, %v660_v49  ;;  %v677_v8 = vsel %vm613_vm5, %v567_v53, %v645_v63  ;;  %v632_v9 = vmul.f32 0.01, %v516_v59  ;;  %v574_v10 = vpop.f32.mrb[15].mxu1 }
 0x117   : > { %v1114_v11 = vpack.c.bf16 %v677_v8, %v676_v50  ;;  %v659_v12 = vsel %vm595_vm6, %v495_v54, %v627_v3  ;;  %v675_v13 = vsel %vm611_vm7, %v559_v58, %v643_v4  ;;  %v580_v14 = vadd.f32 %v1211_v56, %v1392_v24 }
 0x118   : > { %1130 = vst [vmem:[%s1409_s17 + $0x28] sm:$0xff] %v1074_v7   ;;  %v1069_v15 = vpack.c.bf16 %v659_v12, %v658_v62  ;;  %v1109_v16 = vpack.c.bf16 %v675_v13, %v674_v6  ;;  %vm600_vm8 = vcmp.ge.f32.partialorder %v516_v59, 0.0  ;;  %v508_v17 = vadd.f32 %v1392_v24, %v507_v60 }
 0x119   : > { %1138 = vst [vmem:[%s1409_s17 + $0x68] sm:$0xff] %v1114_v11   ;;  %vm616_vm9 = vcmp.ge.f32.partialorder %v580_v14, 0.0  ;;  %v648_v18 = vmul.f32 0.01, %v580_v14  ;;  %v572_v19 = vadd.f32 %v1392_v24, %v571_v61  ;;  %v519_v20 = vadd.f32 %v1196_v0, %v1392_v24 }
 0x11a   : > { %1129 = vst [vmem:[%s1409_s17 + $0x20] sm:$0xff] %v1069_v15   ;;  %1137 = vst [vmem:[%s1409_s17 + $0x60] sm:$0xff] %v1109_v16   ;;  %v630_v21 = vmul.f32 0.01, %v508_v17  ;;  %v583_v22 = vadd.f32 %v1212_v1, %v1392_v24  ;;  %v511_v23 = vadd.f32 %v1392_v24, %v510_v5  ;;  %v664_v25 = vsel %vm600_vm8, %v516_v59, %v632_v9 }
 0x11b   : > { %vm598_vm10 = vcmp.ge.f32.partialorder %v508_v17, 0.0  ;;  %vm601_vm11 = vcmp.ge.f32.partialorder %v519_v20, 0.0  ;;  %v680_v26 = vsel %vm616_vm9, %v580_v14, %v648_v18  ;;  %v633_v27 = vmul.f32 0.01, %v519_v20 }
 0x11c   : > { %vm617_vm12 = vcmp.ge.f32.partialorder %v583_v22, 0.0  ;;  %v649_v28 = vmul.f32 0.01, %v583_v22  ;;  %vm614_vm13 = vcmp.ge.f32.partialorder %v572_v19, 0.0  ;;  %vm599_vm14 = vcmp.ge.f32.partialorder %v511_v23, 0.0 }
 0x11d   : > { %v631_v29 = vmul.f32 0.01, %v511_v23  ;;  %v575_v30 = vadd.f32 %v1392_v24, %v574_v10  ;;  %v662_v31 = vsel %vm598_vm10, %v508_v17, %v630_v21  ;;  %v646_v32 = vmul.f32 0.01, %v572_v19 }
 0x11e   : > { %v665_v33 = vsel %vm601_vm11, %v519_v20, %v633_v27  ;;  %v681_v34 = vsel %vm617_vm12, %v583_v22, %v649_v28 }
 0x11f   : > { %v1084_v35 = vpack.c.bf16 %v665_v33, %v664_v25  ;;  %v1124_v36 = vpack.c.bf16 %v681_v34, %v680_v26  ;;  %v663_v37 = vsel %vm599_vm14, %v511_v23, %v631_v29  ;;  %vm615_vm15 = vcmp.ge.f32.partialorder %v575_v30, 0.0 }
 0x120   : > { %v1079_v38 = vpack.c.bf16 %v663_v37, %v662_v31  ;;  %v647_v39 = vmul.f32 0.01, %v575_v30  ;;  %v678_v40 = vsel %vm614_vm13, %v572_v19, %v646_v32 }
 0x121   : > { %1132 = vst [vmem:[%s1409_s17 + $0x38] sm:$0xff] %v1084_v35   ;;  %1140 = vst [vmem:[%s1409_s17 + $0x78] sm:$0xff] %v1124_v36  }
 0x122   : > { %1131 = vst [vmem:[%s1409_s17 + $0x30] sm:$0xff] %v1079_v38   ;;  %v679_v41 = vsel %vm615_vm15, %v575_v30, %v647_v39 }
 0x123   : > { %v1119_v42 = vpack.c.bf16 %v679_v41, %v678_v40 }
 0x125   : > { %1139 = vst [vmem:[%s1409_s17 + $0x70] sm:$0xff] %v1119_v42  }
 0x126 PF: > { %s13_s14 = sadd.s32 1, %s1299_s14   ;;  %s1468_s12 = smov %s1295_s13 }
 0x127   : > { %p10_p5 = scmp.ge.s32.totalorder %s13_s14, 5   ;;  %s1469_s13 = smov %s1471_s15 }
 0x129   :  { %12 = sbr.rel (!%p10_p5) target bundleno = 2 (0x2), region = 68 }

// kernel: powerpoint_detector_forward.4
= control target key start
LH: loop header
LB: loop body
LE: loop exit
PB: predicated region body
PF: predicated region fallthrough
CT: control target
= control target key end

     0   :  { %s2073_s12 = smov 0   ;;  %s2075_s13 = smov 0   ;;  %s2283_s0 = inlined_call_operand.vmem [shape: bf16[2560,128], index: 0, kind: input, shape index: {}]   ;;  %s2284_s1 = inlined_call_operand.vmem [shape: bf16[128,128], index: 1, kind: input, shape index: {}]   ;;  %s2285_s2 = inlined_call_operand.vmem [shape: f32[1,128], index: 2, kind: input, shape index: {}]   ;;  %s2286_s3 = inlined_call_operand.vmem [shape: bf16[2560,128], index: 3, kind: output, shape index: {}]  }
   0x1   :  { %s2077_s14 = smov 0  }
   0x2 LB: > { %s25_s15 = sadd.s32 1, %s2047_s13  ;;  %p1462_p0 = scmp.ge.s32.totalorder %s2051_s14, 1  ;;  %s2051_s14 = sphi %s2077_s14, %s13_s14   ;;  %s2047_s13 = sphi %s2075_s13, %s2288_s13   ;;  %s2043_s12 = sphi %s2073_s12, %s2287_s12  }
   0x3   : > { %p27_p1 = scmp.ge.s32.totalorder %s25_s15, 5  ;;  %p169_p2 = scmp.lt.s32.totalorder %s2051_s14, 6 }
   0x5   : > { %s2290_s15 = smov (%p27_p1, %s25_s15), 0  ;;  %p170_p3 = pnand %p1462_p0, %p169_p2 }
   0x6   : > { %v1989_v0 = vld [vmem:[%s2284_s1] sm:$0xff] (!%p170_p3)   ;;  %s1463_s18 = sshll.u32 (!%p170_p3), %s2043_s12, 6  ;;  %v1990_v1 = vld [vmem:[%s2284_s1 + $0x8] sm:$0xff] (!%p170_p3)   ;;  %v1991_v2 = vld [vmem:[%s2284_s1 + $0x10] sm:$0xff] (!%p170_p3)  }
   0x7   : > { %173 = sbr.rel (%p170_p3) target bundleno = 328 (0x148), region = 32  ;;  %p204_p4 = scmp.lt.s32.totalorder (!%p170_p3), %s1463_s18, 319  ;;  %1869 = vmatprep.subr.bf16.mxu0 (!%p170_p3), %v1989_v0  ;;  %1949 = vmatprep.subr.bf16.mxu1 (!%p170_p3), %v1989_v0  ;;  %v1992_v3 = vld [vmem:[%s2284_s1 + $0x18] sm:$0xff] (!%p170_p3)   ;;  %v1993_v6 = vld [vmem:[%s2284_s1 + $0x20] sm:$0xff] (!%p170_p3)   ;;  %v1994_v7 = vld [vmem:[%s2284_s1 + $0x28] sm:$0xff] (!%p170_p3)  }
   0x8   : > { %1870 = vmatpush3.bf16.msra.mxu0 (!%p170_p3), %v1989_v0  ;;  %1957 = vmatpush3.bf16.msra.mxu1 (!%p170_p3), %v1989_v0  ;;  %v1995_v8 = vld [vmem:[%s2284_s1 + $0x30] sm:$0xff] (!%p170_p3)   ;;  %v1996_v9 = vld [vmem:[%s2284_s1 + $0x38] sm:$0xff] (!%p170_p3)   ;;  %v2160_v40 = vld [vmem:[%s2285_s2] ss:$0 sm:$0xff] (!%p170_p3) }
   0x9   : > { %1871 = vmatprep.subr.bf16.mxu0 (!%p170_p3), %v1990_v1  ;;  %1950 = vmatprep.subr.bf16.mxu1 (!%p170_p3), %v1990_v1 }
   0xc   : > { %1872 = vmatpush3.bf16.msra.mxu0 (!%p170_p3), %v1990_v1  ;;  %1958 = vmatpush3.bf16.msra.mxu1 (!%p170_p3), %v1990_v1 }
   0xd   : > { %1873 = vmatprep.subr.bf16.mxu0 (!%p170_p3), %v1991_v2  ;;  %1951 = vmatprep.subr.bf16.mxu1 (!%p170_p3), %v1991_v2 }
   0xe   : > { %s2292_s18 = smov (!%p204_p4, %s1463_s18), 319 }
   0xf   : > { %s1464_s23 = sshll.u32 %s2292_s18, 2 }
  0x10   : > { %s2108_s26 = scalar_lea.vmem %s2283_s0, %s1464_s23  ;;  %1874 = vmatpush3.bf16.msra.mxu0 %v1991_v2  ;;  %1959 = vmatpush3.bf16.msra.mxu1 %v1991_v2  ;;  %s2177_s17 = scalar_lea.vmem %s2286_s3, %s1464_s23 }
  0x11   : > { %v1997_v4 = vld [vmem:[%s2108_s26] sm:$0xff]   ;;  %1875 = vmatprep.subr.bf16.mxu0 %v1992_v3  ;;  %1952 = vmatprep.subr.bf16.mxu1 %v1992_v3  ;;  %v1999_v10 = vld [vmem:[%s2108_s26 + $0x8] sm:$0xff]   ;;  %v2001_v12 = vld [vmem:[%s2108_s26 + $0x10] sm:$0xff]  }
  0x12   : > { %v1998_v5 = vld [vmem:[%s2108_s26 + $0x80] sm:$0xff]   ;;  %1885 = vmatprep.mubr.bf16.mxu0 %v1997_v4  ;;  %v2000_v11 = vld [vmem:[%s2108_s26 + $0x88] sm:$0xff]   ;;  %v2002_v13 = vld [vmem:[%s2108_s26 + $0x90] sm:$0xff]  }
  0x13   : > { %1917 = vmatprep.mubr.bf16.mxu1 %v1998_v5  ;;  %v2003_v14 = vld [vmem:[%s2108_s26 + $0x18] sm:$0xff]   ;;  %v2005_v16 = vld [vmem:[%s2108_s26 + $0x20] sm:$0xff]   ;;  %v2007_v18 = vld [vmem:[%s2108_s26 + $0x28] sm:$0xff]  }
  0x14   : > { %1876 = vmatpush3.bf16.msra.mxu0 %v1992_v3  ;;  %1960 = vmatpush3.bf16.msra.mxu1 %v1992_v3  ;;  %v2004_v15 = vld [vmem:[%s2108_s26 + $0x98] sm:$0xff]   ;;  %v2006_v17 = vld [vmem:[%s2108_s26 + $0xa0] sm:$0xff]   ;;  %v2008_v19 = vld [vmem:[%s2108_s26 + $0xa8] sm:$0xff]  }
  0x15   : > { %1877 = vmatprep.subr.bf16.mxu0 %v1993_v6  ;;  %1953 = vmatprep.subr.bf16.mxu1 %v1993_v6  ;;  %v2009_v20 = vld [vmem:[%s2108_s26 + $0x30] sm:$0xff]   ;;  %v2011_v22 = vld [vmem:[%s2108_s26 + $0x38] sm:$0xff]   ;;  %v2013_v24 = vld [vmem:[%s2108_s26 + $0x40] sm:$0xff]  }
  0x16   : > { %v2010_v21 = vld [vmem:[%s2108_s26 + $0xb0] sm:$0xff]   ;;  %v2012_v23 = vld [vmem:[%s2108_s26 + $0xb8] sm:$0xff]   ;;  %v2014_v25 = vld [vmem:[%s2108_s26 + $0xc0] sm:$0xff]  }
  0x17   : > { %v2015_v26 = vld [vmem:[%s2108_s26 + $0x48] sm:$0xff]   ;;  %v2017_v28 = vld [vmem:[%s2108_s26 + $0x50] sm:$0xff]   ;;  %v2019_v30 = vld [vmem:[%s2108_s26 + $0x58] sm:$0xff]  }
  0x18   : > { %1878 = vmatpush3.bf16.msra.mxu0 %v1993_v6  ;;  %1961 = vmatpush3.bf16.msra.mxu1 %v1993_v6  ;;  %v2016_v27 = vld [vmem:[%s2108_s26 + $0xc8] sm:$0xff]   ;;  %v2018_v29 = vld [vmem:[%s2108_s26 + $0xd0] sm:$0xff]   ;;  %v2020_v31 = vld [vmem:[%s2108_s26 + $0xd8] sm:$0xff]  }
  0x19   : > { %1879 = vmatprep.subr.bf16.mxu0 %v1994_v7  ;;  %1954 = vmatprep.subr.bf16.mxu1 %v1994_v7  ;;  %v2021_v32 = vld [vmem:[%s2108_s26 + $0x60] sm:$0xff]   ;;  %v2023_v34 = vld [vmem:[%s2108_s26 + $0x68] sm:$0xff]   ;;  %v2025_v36 = vld [vmem:[%s2108_s26 + $0x70] sm:$0xff]  }
  0x1a   : > { %v2022_v33 = vld [vmem:[%s2108_s26 + $0xe0] sm:$0xff]   ;;  %v2024_v35 = vld [vmem:[%s2108_s26 + $0xe8] sm:$0xff]   ;;  %v2026_v37 = vld [vmem:[%s2108_s26 + $0xf0] sm:$0xff]  }
  0x1b   : > { %v2027_v38 = vld [vmem:[%s2108_s26 + $0x78] sm:$0xff]  }
  0x1c   : > { %1880 = vmatpush3.bf16.msra.mxu0 %v1994_v7  ;;  %1962 = vmatpush3.bf16.msra.mxu1 %v1994_v7  ;;  %v2028_v39 = vld [vmem:[%s2108_s26 + $0xf8] sm:$0xff]  }
  0x1d   : > { %1881 = vmatprep.subr.bf16.mxu0 %v1995_v8  ;;  %1955 = vmatprep.subr.bf16.mxu1 %v1995_v8 }
  0x20   : > { %1882 = vmatpush3.bf16.msra.mxu0 %v1995_v8  ;;  %1963 = vmatpush3.bf16.msra.mxu1 %v1995_v8 }
  0x21   : > { %1883 = vmatprep.subr.bf16.mxu0 %v1996_v9  ;;  %1956 = vmatprep.subr.bf16.mxu1 %v1996_v9 }
  0x24   : > { %1884 = vmatpush3.bf16.msra.mxu0 %v1996_v9  ;;  %1964 = vmatpush3.bf16.msra.mxu1 %v1996_v9 }
  0x27   : > { %1886 = vmatmul.mubr.bf16.vlgmr.msra.gmra.mrb[0].mxu0 %v1999_v10  ;;  %1918 = vmatmul.mubr.bf16.vlgmr.msra.gmra.mrb[0].mxu1 %v2000_v11 }
  0x28   : > { %1889 = vmatprep.mubr.bf16.mxu0 %v2001_v12  ;;  %1921 = vmatprep.mubr.bf16.mxu1 %v2002_v13 }
  0x2f   : > { %1890 = vmatmul.mubr.bf16.gmra.mrb[4].mxu0 %v2003_v14  ;;  %1922 = vmatmul.mubr.bf16.gmra.mrb[4].mxu1 %v2004_v15 }
  0x30   : > { %1893 = vmatprep.mubr.bf16.mxu0 %v2005_v16  ;;  %1925 = vmatprep.mubr.bf16.mxu1 %v2006_v17 }
  0x37   : > { %1894 = vmatmul.mubr.bf16.gmra.mrb[8].mxu0 %v2007_v18  ;;  %1926 = vmatmul.mubr.bf16.gmra.mrb[8].mxu1 %v2008_v19 }
  0x38   : > { %1897 = vmatprep.mubr.bf16.mxu0 %v2009_v20  ;;  %1929 = vmatprep.mubr.bf16.mxu1 %v2010_v21 }
  0x3f   : > { %1898 = vmatmul.mubr.bf16.gmra.mrb[12].mxu0 %v2011_v22  ;;  %1930 = vmatmul.mubr.bf16.gmra.mrb[12].mxu1 %v2012_v23 }
  0x40   : > { %1901 = vmatprep.mubr.bf16.mxu0 %v2013_v24  ;;  %1933 = vmatprep.mubr.bf16.mxu1 %v2014_v25 }
  0x47   : > { %1902 = vmatmul.mubr.bf16.gmra.mrb[16].mxu0 %v2015_v26  ;;  %1934 = vmatmul.mubr.bf16.gmra.mrb[16].mxu1 %v2016_v27 }
  0x48   : > { %1905 = vmatprep.mubr.bf16.mxu0 %v2017_v28  ;;  %1937 = vmatprep.mubr.bf16.mxu1 %v2018_v29 }
  0x4f   : > { %1906 = vmatmul.mubr.bf16.gmra.mrb[20].mxu0 %v2019_v30  ;;  %1938 = vmatmul.mubr.bf16.gmra.mrb[20].mxu1 %v2020_v31 }
  0x50   : > { %1909 = vmatprep.mubr.bf16.mxu0 %v2021_v32  ;;  %1941 = vmatprep.mubr.bf16.mxu1 %v2022_v33 }
  0x57   : > { %1910 = vmatmul.mubr.bf16.gmra.mrb[24].mxu0 %v2023_v34  ;;  %1942 = vmatmul.mubr.bf16.gmra.mrb[24].mxu1 %v2024_v35 }
  0x58   : > { %1913 = vmatprep.mubr.bf16.mxu0 %v2025_v36  ;;  %1945 = vmatprep.mubr.bf16.mxu1 %v2026_v37 }
  0x5f   : > { %1914 = vmatmul.mubr.bf16.gmra.mrb[28].mxu0 %v2027_v38  ;;  %1946 = vmatmul.mubr.bf16.gmra.mrb[28].mxu1 %v2028_v39 }
  0xfa   : > { %v1887_v41 = vpop.f32.mrb[0].mxu0  ;;  %v1919_v42 = vpop.f32.mrb[0].mxu1 }
  0xfb   : > { %v596_v43 = vadd.f32 %v1887_v41, %v2160_v40  ;;  %v724_v44 = vadd.f32 %v1919_v42, %v2160_v40  ;;  %v587_v45 = vpop.f32.mrb[1].mxu0  ;;  %v715_v46 = vpop.f32.mrb[1].mxu1 }
  0xfc   : > { %v588_v47 = vadd.f32 %v2160_v40, %v587_v45  ;;  %v716_v48 = vadd.f32 %v2160_v40, %v715_v46  ;;  %v1888_v49 = vpop.f32.mrb[2].mxu0  ;;  %v1920_v50 = vpop.f32.mrb[2].mxu1 }
  0xfd   : > { %vm844_vm0 = vcmp.ge.f32.partialorder %v596_v43, 0.0  ;;  %v908_v51 = vmul.f32 0.01, %v596_v43  ;;  %vm876_vm1 = vcmp.ge.f32.partialorder %v724_v44, 0.0  ;;  %v940_v52 = vmul.f32 0.01, %v724_v44 }
  0xfe   : > { %vm842_vm2 = vcmp.ge.f32.partialorder %v588_v47, 0.0  ;;  %v906_v53 = vmul.f32 0.01, %v588_v47  ;;  %vm874_vm3 = vcmp.ge.f32.partialorder %v716_v48, 0.0  ;;  %v938_v54 = vmul.f32 0.01, %v716_v48 }
  0xff   : > { %v599_v55 = vadd.f32 %v1888_v49, %v2160_v40  ;;  %v727_v56 = vadd.f32 %v1920_v50, %v2160_v40  ;;  %v590_v57 = vpop.f32.mrb[3].mxu0  ;;  %v718_v58 = vpop.f32.mrb[3].mxu1  ;;  %v972_v59 = vsel %vm844_vm0, %v596_v43, %v908_v51  ;;  %v1004_v60 = vsel %vm876_vm1, %v724_v44, %v940_v52 }
 0x100   : > { %v591_v61 = vadd.f32 %v2160_v40, %v590_v57  ;;  %v719_v62 = vadd.f32 %v2160_v40, %v718_v58  ;;  %v970_v3 = vsel %vm842_vm2, %v588_v47, %v906_v53  ;;  %v1002_v4 = vsel %vm874_vm3, %v716_v48, %v938_v54 }
 0x101   : > { %vm845_vm4 = vcmp.ge.f32.partialorder %v599_v55, 0.0  ;;  %v909_v63 = vmul.f32 0.01, %v599_v55  ;;  %vm877_vm5 = vcmp.ge.f32.partialorder %v727_v56, 0.0  ;;  %v941_v0 = vmul.f32 0.01, %v727_v56 }
 0x102   : > { %vm843_vm6 = vcmp.ge.f32.partialorder %v591_v61, 0.0  ;;  %v907_v1 = vmul.f32 0.01, %v591_v61  ;;  %vm875_vm7 = vcmp.ge.f32.partialorder %v719_v62, 0.0  ;;  %v939_v2 = vmul.f32 0.01, %v719_v62 }
 0x103   : > { %v973_v5 = vsel %vm845_vm4, %v599_v55, %v909_v63  ;;  %v1005_v6 = vsel %vm877_vm5, %v727_v56, %v941_v0  ;;  %v1891_v7 = vpop.f32.mrb[4].mxu0  ;;  %v1923_v8 = vpop.f32.mrb[4].mxu1 }
 0x104   : > { %v1646_v9 = vpack.c.bf16 %v973_v5, %v972_v59  ;;  %v1726_v10 = vpack.c.bf16 %v1005_v6, %v1004_v60  ;;  %v971_v11 = vsel %vm843_vm6, %v591_v61, %v907_v1  ;;  %v1003_v12 = vsel %vm875_vm7, %v719_v62, %v939_v2  ;;  %v603_v13 = vpop.f32.mrb[5].mxu0  ;;  %v731_v14 = vpop.f32.mrb[5].mxu1 }
 0x105   : > { %v1641_v15 = vpack.c.bf16 %v971_v11, %v970_v3  ;;  %v1721_v16 = vpack.c.bf16 %v1003_v12, %v1002_v4  ;;  %v612_v17 = vadd.f32 %v1891_v7, %v2160_v40  ;;  %v740_v18 = vadd.f32 %v1923_v8, %v2160_v40  ;;  %v1892_v19 = vpop.f32.mrb[6].mxu0  ;;  %v1924_v20 = vpop.f32.mrb[6].mxu1 }
 0x106   : > { %1798 = vst [vmem:[%s2177_s17 + $0x8] sm:$0xff] %v1646_v9   ;;  %1814 = vst [vmem:[%s2177_s17 + $0x88] sm:$0xff] %v1726_v10   ;;  %v604_v21 = vadd.f32 %v2160_v40, %v603_v13  ;;  %v732_v22 = vadd.f32 %v2160_v40, %v731_v14  ;;  %v615_v23 = vadd.f32 %v1892_v19, %v2160_v40  ;;  %v606_v25 = vpop.f32.mrb[7].mxu0  ;;  %v734_v26 = vpop.f32.mrb[7].mxu1 }
 0x107   : > { %v743_v24 = vadd.f32 %v1924_v20, %v2160_v40  ;;  %1642 = vst [vmem:[%s2177_s17] sm:$0xff] %v1641_v15   ;;  %1813 = vst [vmem:[%s2177_s17 + $0x80] sm:$0xff] %v1721_v16   ;;  %vm848_vm8 = vcmp.ge.f32.partialorder %v612_v17, 0.0  ;;  %v912_v27 = vmul.f32 0.01, %v612_v17  ;;  %vm880_vm9 = vcmp.ge.f32.partialorder %v740_v18, 0.0 }
 0x108   : > { %v944_v28 = vmul.f32 0.01, %v740_v18  ;;  %vm846_vm10 = vcmp.ge.f32.partialorder %v604_v21, 0.0  ;;  %v910_v29 = vmul.f32 0.01, %v604_v21  ;;  %vm878_vm11 = vcmp.ge.f32.partialorder %v732_v22, 0.0 }
 0x109   : > { %v942_v30 = vmul.f32 0.01, %v732_v22  ;;  %v976_v31 = vsel %vm848_vm8, %v612_v17, %v912_v27  ;;  %vm849_vm12 = vcmp.ge.f32.partialorder %v615_v23, 0.0  ;;  %v913_v33 = vmul.f32 0.01, %v615_v23 }
 0x10a   : > { %v1008_v32 = vsel %vm880_vm9, %v740_v18, %v944_v28  ;;  %v974_v34 = vsel %vm846_vm10, %v604_v21, %v910_v29  ;;  %vm881_vm13 = vcmp.ge.f32.partialorder %v743_v24, 0.0  ;;  %v945_v36 = vmul.f32 0.01, %v743_v24  ;;  %v1895_v37 = vpop.f32.mrb[8].mxu0  ;;  %v1927_v38 = vpop.f32.mrb[8].mxu1 }
 0x10b   : > { %v1006_v35 = vsel %vm878_vm11, %v732_v22, %v942_v30  ;;  %v977_v39 = vsel %vm849_vm12, %v615_v23, %v913_v33  ;;  %v607_v41 = vadd.f32 %v2160_v40, %v606_v25  ;;  %v735_v42 = vadd.f32 %v2160_v40, %v734_v26  ;;  %v619_v44 = vpop.f32.mrb[9].mxu0  ;;  %v747_v45 = vpop.f32.mrb[9].mxu1 }
 0x10c   : > { %v628_v43 = vadd.f32 %v1895_v37, %v2160_v40  ;;  %v1656_v46 = vpack.c.bf16 %v977_v39, %v976_v31  ;;  %v1009_v47 = vsel %vm881_vm13, %v743_v24, %v945_v36  ;;  %v756_v48 = vadd.f32 %v1927_v38, %v2160_v40  ;;  %v1896_v50 = vpop.f32.mrb[10].mxu0  ;;  %v1928_v51 = vpop.f32.mrb[10].mxu1 }
 0x10d   : > { %v620_v49 = vadd.f32 %v2160_v40, %v619_v44  ;;  %v1736_v52 = vpack.c.bf16 %v1009_v47, %v1008_v32  ;;  %vm847_vm14 = vcmp.ge.f32.partialorder %v607_v41, 0.0  ;;  %v911_v53 = vmul.f32 0.01, %v607_v41  ;;  %v622_v54 = vpop.f32.mrb[11].mxu0  ;;  %v750_v55 = vpop.f32.mrb[11].mxu1 }
 0x10e   : > { %vm879_vm15 = vcmp.ge.f32.partialorder %v735_v42, 0.0  ;;  %1800 = vst [vmem:[%s2177_s17 + $0x18] sm:$0xff] %v1656_v46   ;;  %v943_v56 = vmul.f32 0.01, %v735_v42  ;;  %vm852_vm0 = vcmp.ge.f32.partialorder %v628_v43, 0.0  ;;  %vm884_vm1 = vcmp.ge.f32.partialorder %v756_v48, 0.0 }
 0x10f   : > { %v916_v57 = vmul.f32 0.01, %v628_v43  ;;  %1816 = vst [vmem:[%s2177_s17 + $0x98] sm:$0xff] %v1736_v52   ;;  %v975_v58 = vsel %vm847_vm14, %v607_v41, %v911_v53  ;;  %v948_v59 = vmul.f32 0.01, %v756_v48  ;;  %vm850_vm2 = vcmp.ge.f32.partialorder %v620_v49, 0.0 }
 0x110   : > { %v914_v60 = vmul.f32 0.01, %v620_v49  ;;  %v1651_v61 = vpack.c.bf16 %v975_v58, %v974_v34  ;;  %v1007_v62 = vsel %vm879_vm15, %v735_v42, %v943_v56  ;;  %v748_v0 = vadd.f32 %v2160_v40, %v747_v45 }
 0x111   : > { %v980_v63 = vsel %vm852_vm0, %v628_v43, %v916_v57  ;;  %v1731_v1 = vpack.c.bf16 %v1007_v62, %v1006_v35  ;;  %v1012_v2 = vsel %vm884_vm1, %v756_v48, %v948_v59  ;;  %v631_v4 = vadd.f32 %v1896_v50, %v2160_v40 }
 0x112   : > { %v978_v3 = vsel %vm850_vm2, %v620_v49, %v914_v60  ;;  %1799 = vst [vmem:[%s2177_s17 + $0x10] sm:$0xff] %v1651_v61   ;;  %vm882_vm3 = vcmp.ge.f32.partialorder %v748_v0, 0.0  ;;  %v946_v5 = vmul.f32 0.01, %v748_v0  ;;  %v759_v6 = vadd.f32 %v1928_v51, %v2160_v40  ;;  %v1899_v8 = vpop.f32.mrb[12].mxu0  ;;  %v1931_v9 = vpop.f32.mrb[12].mxu1 }
 0x113   : > { %v623_v7 = vadd.f32 %v2160_v40, %v622_v54  ;;  %1815 = vst [vmem:[%s2177_s17 + $0x90] sm:$0xff] %v1731_v1   ;;  %vm853_vm4 = vcmp.ge.f32.partialorder %v631_v4, 0.0  ;;  %v917_v10 = vmul.f32 0.01, %v631_v4  ;;  %v751_v11 = vadd.f32 %v2160_v40, %v750_v55  ;;  %v635_v13 = vpop.f32.mrb[13].mxu0  ;;  %v763_v14 = vpop.f32.mrb[13].mxu1 }
 0x114   : > { %v644_v12 = vadd.f32 %v1899_v8, %v2160_v40  ;;  %v1010_v15 = vsel %vm882_vm3, %v748_v0, %v946_v5  ;;  %vm885_vm5 = vcmp.ge.f32.partialorder %v759_v6, 0.0  ;;  %v949_v16 = vmul.f32 0.01, %v759_v6  ;;  %v1900_v17 = vpop.f32.mrb[14].mxu0  ;;  %v1932_v18 = vpop.f32.mrb[14].mxu1 }
 0x115   : > { %vm851_vm6 = vcmp.ge.f32.partialorder %v623_v7, 0.0  ;;  %v981_v19 = vsel %vm853_vm4, %v631_v4, %v917_v10  ;;  %v915_v20 = vmul.f32 0.01, %v623_v7  ;;  %vm883_vm7 = vcmp.ge.f32.partialorder %v751_v11, 0.0  ;;  %v638_v22 = vpop.f32.mrb[15].mxu0  ;;  %v766_v26 = vpop.f32.mrb[15].mxu1 }
 0x116   : > { %v947_v21 = vmul.f32 0.01, %v751_v11  ;;  %v1666_v23 = vpack.c.bf16 %v981_v19, %v980_v63  ;;  %v1013_v24 = vsel %vm885_vm5, %v759_v6, %v949_v16  ;;  %vm856_vm8 = vcmp.ge.f32.partialorder %v644_v12, 0.0 }
 0x117   : > { %v920_v25 = vmul.f32 0.01, %v644_v12  ;;  %v1746_v27 = vpack.c.bf16 %v1013_v24, %v1012_v2  ;;  %v979_v28 = vsel %vm851_vm6, %v623_v7, %v915_v20  ;;  %v772_v30 = vadd.f32 %v1931_v9, %v2160_v40 }
 0x118   : > { %v1011_v29 = vsel %vm883_vm7, %v751_v11, %v947_v21  ;;  %1802 = vst [vmem:[%s2177_s17 + $0x28] sm:$0xff] %v1666_v23   ;;  %v1661_v31 = vpack.c.bf16 %v979_v28, %v978_v3  ;;  %v636_v34 = vadd.f32 %v2160_v40, %v635_v13  ;;  %v764_v36 = vadd.f32 %v2160_v40, %v763_v14 }
 0x119   : > { %v1741_v32 = vpack.c.bf16 %v1011_v29, %v1010_v15  ;;  %v984_v33 = vsel %vm856_vm8, %v644_v12, %v920_v25  ;;  %1818 = vst [vmem:[%s2177_s17 + $0xa8] sm:$0xff] %v1746_v27   ;;  %vm888_vm9 = vcmp.ge.f32.partialorder %v772_v30, 0.0  ;;  %v952_v35 = vmul.f32 0.01, %v772_v30 }
 0x11a   : > { %v647_v37 = vadd.f32 %v1900_v17, %v2160_v40  ;;  %1801 = vst [vmem:[%s2177_s17 + $0x20] sm:$0xff] %v1661_v31   ;;  %vm854_vm10 = vcmp.ge.f32.partialorder %v636_v34, 0.0  ;;  %v918_v38 = vmul.f32 0.01, %v636_v34  ;;  %v775_v39 = vadd.f32 %v1932_v18, %v2160_v40  ;;  %v1903_v42 = vpop.f32.mrb[16].mxu0  ;;  %v1935_v43 = vpop.f32.mrb[16].mxu1 }
 0x11b   : > { %1817 = vst [vmem:[%s2177_s17 + $0xa0] sm:$0xff] %v1741_v32   ;;  %v639_v41 = vadd.f32 %v2160_v40, %v638_v22  ;;  %v1016_v44 = vsel %vm888_vm9, %v772_v30, %v952_v35  ;;  %vm886_vm11 = vcmp.ge.f32.partialorder %v764_v36, 0.0  ;;  %v950_v45 = vmul.f32 0.01, %v764_v36  ;;  %v651_v46 = vpop.f32.mrb[17].mxu0  ;;  %v779_v47 = vpop.f32.mrb[17].mxu1 }
 0x11c   : > { %vm857_vm12 = vcmp.ge.f32.partialorder %v647_v37, 0.0  ;;  %v982_v48 = vsel %vm854_vm10, %v636_v34, %v918_v38  ;;  %v921_v49 = vmul.f32 0.01, %v647_v37  ;;  %vm889_vm13 = vcmp.ge.f32.partialorder %v775_v39, 0.0  ;;  %v1904_v51 = vpop.f32.mrb[18].mxu0  ;;  %v1936_v55 = vpop.f32.mrb[18].mxu1 }
 0x11d   : > { %v953_v50 = vmul.f32 0.01, %v775_v39  ;;  %v1014_v52 = vsel %vm886_vm11, %v764_v36, %v950_v45  ;;  %vm855_vm14 = vcmp.ge.f32.partialorder %v639_v41, 0.0  ;;  %v919_v53 = vmul.f32 0.01, %v639_v41  ;;  %v654_v56 = vpop.f32.mrb[19].mxu0 }
 0x11e   : > { %v767_v54 = vadd.f32 %v2160_v40, %v766_v26  ;;  %v985_v57 = vsel %vm857_vm12, %v647_v37, %v921_v49  ;;  %v660_v59 = vadd.f32 %v1903_v42, %v2160_v40  ;;  %v788_v60 = vadd.f32 %v1935_v43, %v2160_v40  ;;  %v782_v61 = vpop.f32.mrb[19].mxu1 }
 0x11f   : > { %v1017_v58 = vsel %vm889_vm13, %v775_v39, %v953_v50  ;;  %v1676_v62 = vpack.c.bf16 %v985_v57, %v984_v33  ;;  %v983_v0 = vsel %vm855_vm14, %v639_v41, %v919_v53  ;;  %v652_v5 = vadd.f32 %v2160_v40, %v651_v46 }
 0x120   : > { %v1756_v63 = vpack.c.bf16 %v1017_v58, %v1016_v44  ;;  %vm887_vm15 = vcmp.ge.f32.partialorder %v767_v54, 0.0  ;;  %v1671_v1 = vpack.c.bf16 %v983_v0, %v982_v48  ;;  %v951_v2 = vmul.f32 0.01, %v767_v54 }
 0x121   : > { %vm860_vm0 = vcmp.ge.f32.partialorder %v660_v59, 0.0  ;;  %v924_v3 = vmul.f32 0.01, %v660_v59  ;;  %1804 = vst [vmem:[%s2177_s17 + $0x38] sm:$0xff] %v1676_v62   ;;  %vm892_vm1 = vcmp.ge.f32.partialorder %v788_v60, 0.0  ;;  %v780_v6 = vadd.f32 %v2160_v40, %v779_v47 }
 0x122   : > { %1820 = vst [vmem:[%s2177_s17 + $0xb8] sm:$0xff] %v1756_v63   ;;  %v956_v4 = vmul.f32 0.01, %v788_v60  ;;  %1803 = vst [vmem:[%s2177_s17 + $0x30] sm:$0xff] %v1671_v1   ;;  %v1015_v7 = vsel %vm887_vm15, %v767_v54, %v951_v2  ;;  %v663_v9 = vadd.f32 %v1904_v51, %v2160_v40  ;;  %v791_v10 = vadd.f32 %v1936_v55, %v2160_v40  ;;  %v1907_v11 = vpop.f32.mrb[20].mxu0  ;;  %v1939_v12 = vpop.f32.mrb[20].mxu1 }
 0x123   : > { %v988_v8 = vsel %vm860_vm0, %v660_v59, %v924_v3  ;;  %v1751_v13 = vpack.c.bf16 %v1015_v7, %v1014_v52  ;;  %vm858_vm2 = vcmp.ge.f32.partialorder %v652_v5, 0.0  ;;  %v922_v15 = vmul.f32 0.01, %v652_v5  ;;  %v667_v16 = vpop.f32.mrb[21].mxu0  ;;  %v795_v17 = vpop.f32.mrb[21].mxu1 }
 0x124   : > { %v1020_v14 = vsel %vm892_vm1, %v788_v60, %v956_v4  ;;  %vm890_vm3 = vcmp.ge.f32.partialorder %v780_v6, 0.0  ;;  %v954_v18 = vmul.f32 0.01, %v780_v6  ;;  %vm861_vm4 = vcmp.ge.f32.partialorder %v663_v9, 0.0  ;;  %v1908_v23 = vpop.f32.mrb[22].mxu0  ;;  %v1940_v24 = vpop.f32.mrb[22].mxu1 }
 0x125   : > { %v925_v19 = vmul.f32 0.01, %v663_v9  ;;  %1819 = vst [vmem:[%s2177_s17 + $0xb0] sm:$0xff] %v1751_v13   ;;  %v986_v20 = vsel %vm858_vm2, %v652_v5, %v922_v15  ;;  %vm893_vm5 = vcmp.ge.f32.partialorder %v791_v10, 0.0  ;;  %v957_v21 = vmul.f32 0.01, %v791_v10 }
 0x126   : > { %v655_v22 = vadd.f32 %v2160_v40, %v654_v56  ;;  %v1018_v25 = vsel %vm890_vm3, %v780_v6, %v954_v18  ;;  %v783_v27 = vadd.f32 %v2160_v40, %v782_v61  ;;  %v676_v28 = vadd.f32 %v1907_v11, %v2160_v40  ;;  %v670_v29 = vpop.f32.mrb[23].mxu0  ;;  %v798_v30 = vpop.f32.mrb[23].mxu1 }
 0x127   : > { %v989_v26 = vsel %vm861_vm4, %v663_v9, %v925_v19  ;;  %v1021_v32 = vsel %vm893_vm5, %v791_v10, %v957_v21  ;;  %v804_v38 = vadd.f32 %v1939_v12, %v2160_v40  ;;  %v668_v39 = vadd.f32 %v2160_v40, %v667_v16 }
 0x128   : > { %v1686_v31 = vpack.c.bf16 %v989_v26, %v988_v8  ;;  %vm859_vm6 = vcmp.ge.f32.partialorder %v655_v22, 0.0  ;;  %v923_v33 = vmul.f32 0.01, %v655_v22  ;;  %v1766_v34 = vpack.c.bf16 %v1021_v32, %v1020_v14 }
 0x129   : > { %vm891_vm7 = vcmp.ge.f32.partialorder %v783_v27, 0.0  ;;  %v955_v35 = vmul.f32 0.01, %v783_v27  ;;  %vm864_vm8 = vcmp.ge.f32.partialorder %v676_v28, 0.0  ;;  %v928_v37 = vmul.f32 0.01, %v676_v28 }
 0x12a   : > { %1806 = vst [vmem:[%s2177_s17 + $0x48] sm:$0xff] %v1686_v31   ;;  %v987_v36 = vsel %vm859_vm6, %v655_v22, %v923_v33  ;;  %1822 = vst [vmem:[%s2177_s17 + $0xc8] sm:$0xff] %v1766_v34   ;;  %v796_v43 = vadd.f32 %v2160_v40, %v795_v17  ;;  %v679_v44 = vadd.f32 %v1908_v23, %v2160_v40  ;;  %v1911_v45 = vpop.f32.mrb[24].mxu0  ;;  %v1943_v46 = vpop.f32.mrb[24].mxu1  ;;  %vm896_vm9 = vcmp.ge.f32.partialorder %v804_v38, 0.0 }
 0x12b   : > { %v1681_v41 = vpack.c.bf16 %v987_v36, %v986_v20  ;;  %v1019_v42 = vsel %vm891_vm7, %v783_v27, %v955_v35  ;;  %v960_v48 = vmul.f32 0.01, %v804_v38  ;;  %v683_v49 = vpop.f32.mrb[25].mxu0  ;;  %v811_v50 = vpop.f32.mrb[25].mxu1  ;;  %v992_v51 = vsel %vm864_vm8, %v676_v28, %v928_v37 }
 0x12c   : > { %v1761_v47 = vpack.c.bf16 %v1019_v42, %v1018_v25  ;;  %vm862_vm10 = vcmp.ge.f32.partialorder %v668_v39, 0.0  ;;  %v926_v52 = vmul.f32 0.01, %v668_v39  ;;  %v958_v53 = vmul.f32 0.01, %v796_v43  ;;  %v1912_v56 = vpop.f32.mrb[26].mxu0 }
 0x12d   : > { %1805 = vst [vmem:[%s2177_s17 + $0x40] sm:$0xff] %v1681_v41   ;;  %vm894_vm11 = vcmp.ge.f32.partialorder %v796_v43, 0.0  ;;  %vm865_vm12 = vcmp.ge.f32.partialorder %v679_v44, 0.0  ;;  %v929_v54 = vmul.f32 0.01, %v679_v44  ;;  %v807_v55 = vadd.f32 %v1940_v24, %v2160_v40  ;;  %v1944_v57 = vpop.f32.mrb[26].mxu1 }
 0x12e   : > { %1821 = vst [vmem:[%s2177_s17 + $0xc0] sm:$0xff] %v1761_v47   ;;  %v1024_v58 = vsel %vm896_vm9, %v804_v38, %v960_v48  ;;  %v990_v59 = vsel %vm862_vm10, %v668_v39, %v926_v52  ;;  %v671_v60 = vadd.f32 %v2160_v40, %v670_v29  ;;  %v799_v61 = vadd.f32 %v2160_v40, %v798_v30  ;;  %v686_v62 = vpop.f32.mrb[27].mxu0  ;;  %v814_v63 = vpop.f32.mrb[27].mxu1 }
 0x12f   : > { %v993_v0 = vsel %vm865_vm12, %v679_v44, %v929_v54  ;;  %vm897_vm13 = vcmp.ge.f32.partialorder %v807_v55, 0.0  ;;  %v961_v1 = vmul.f32 0.01, %v807_v55  ;;  %v692_v2 = vadd.f32 %v1911_v45, %v2160_v40 }
 0x130   : > { %v1696_v3 = vpack.c.bf16 %v993_v0, %v992_v51  ;;  %vm863_vm14 = vcmp.ge.f32.partialorder %v671_v60, 0.0  ;;  %v927_v4 = vmul.f32 0.01, %v671_v60  ;;  %vm895_vm15 = vcmp.ge.f32.partialorder %v799_v61, 0.0 }
 0x131   : > { %v1025_v5 = vsel %vm897_vm13, %v807_v55, %v961_v1  ;;  %v959_v6 = vmul.f32 0.01, %v799_v61  ;;  %vm868_vm0 = vcmp.ge.f32.partialorder %v692_v2, 0.0  ;;  %v932_v7 = vmul.f32 0.01, %v692_v2 }
 0x132   : > { %1808 = vst [vmem:[%s2177_s17 + $0x58] sm:$0xff] %v1696_v3   ;;  %v1776_v8 = vpack.c.bf16 %v1025_v5, %v1024_v58  ;;  %v991_v9 = vsel %vm863_vm14, %v671_v60, %v927_v4  ;;  %v820_v10 = vadd.f32 %v1943_v46, %v2160_v40  ;;  %v684_v11 = vadd.f32 %v2160_v40, %v683_v49  ;;  %v1915_v12 = vpop.f32.mrb[28].mxu0  ;;  %v1947_v13 = vpop.f32.mrb[28].mxu1 }
 0x133   : > { %v1022_v14 = vsel %vm894_vm11, %v796_v43, %v958_v53  ;;  %v1691_v15 = vpack.c.bf16 %v991_v9, %v990_v59  ;;  %v1023_v16 = vsel %vm895_vm15, %v799_v61, %v959_v6  ;;  %v812_v17 = vadd.f32 %v2160_v40, %v811_v50  ;;  %v699_v18 = vpop.f32.mrb[29].mxu0  ;;  %v827_v19 = vpop.f32.mrb[29].mxu1 }
 0x134   : > { %1824 = vst [vmem:[%s2177_s17 + $0xd8] sm:$0xff] %v1776_v8   ;;  %v1771_v20 = vpack.c.bf16 %v1023_v16, %v1022_v14  ;;  %vm900_vm1 = vcmp.ge.f32.partialorder %v820_v10, 0.0  ;;  %v964_v21 = vmul.f32 0.01, %v820_v10  ;;  %vm866_vm2 = vcmp.ge.f32.partialorder %v684_v11, 0.0  ;;  %v1916_v22 = vpop.f32.mrb[30].mxu0 }
 0x135   : > { %v1948_v23 = vpop.f32.mrb[30].mxu1  ;;  %1807 = vst [vmem:[%s2177_s17 + $0x50] sm:$0xff] %v1691_v15   ;;  %v996_v24 = vsel %vm868_vm0, %v692_v2, %v932_v7  ;;  %v930_v25 = vmul.f32 0.01, %v684_v11  ;;  %vm898_vm3 = vcmp.ge.f32.partialorder %v812_v17, 0.0  ;;  %v695_v26 = vadd.f32 %v1912_v56, %v2160_v40  ;;  %v702_v27 = vpop.f32.mrb[31].mxu0 }
 0x136   : > { %1823 = vst [vmem:[%s2177_s17 + $0xd0] sm:$0xff] %v1771_v20   ;;  %v962_v28 = vmul.f32 0.01, %v812_v17  ;;  %v823_v29 = vadd.f32 %v1944_v57, %v2160_v40  ;;  %v687_v30 = vadd.f32 %v2160_v40, %v686_v62  ;;  %v815_v31 = vadd.f32 %v2160_v40, %v814_v63  ;;  %v830_v32 = vpop.f32.mrb[31].mxu1 }
 0x137   : > { %v1028_v33 = vsel %vm900_vm1, %v820_v10, %v964_v21  ;;  %v994_v34 = vsel %vm866_vm2, %v684_v11, %v930_v25  ;;  %vm869_vm4 = vcmp.ge.f32.partialorder %v695_v26, 0.0  ;;  %v933_v35 = vmul.f32 0.01, %v695_v26 }
 0x138   : > { %vm901_vm5 = vcmp.ge.f32.partialorder %v823_v29, 0.0  ;;  %v965_v36 = vmul.f32 0.01, %v823_v29  ;;  %vm867_vm6 = vcmp.ge.f32.partialorder %v687_v30, 0.0  ;;  %v931_v37 = vmul.f32 0.01, %v687_v30 }
 0x139   : > { %v997_v38 = vsel %vm869_vm4, %v695_v26, %v933_v35  ;;  %vm899_vm7 = vcmp.ge.f32.partialorder %v815_v31, 0.0  ;;  %v963_v39 = vmul.f32 0.01, %v815_v31  ;;  %v708_v41 = vadd.f32 %v1915_v12, %v2160_v40 }
 0x13a   : > { %v1706_v42 = vpack.c.bf16 %v997_v38, %v996_v24  ;;  %v1029_v43 = vsel %vm901_vm5, %v823_v29, %v965_v36  ;;  %v995_v44 = vsel %vm867_vm6, %v687_v30, %v931_v37  ;;  %v836_v45 = vadd.f32 %v1947_v13, %v2160_v40 }
 0x13b   : > { %v1026_v46 = vsel %vm898_vm3, %v812_v17, %v962_v28  ;;  %v1786_v47 = vpack.c.bf16 %v1029_v43, %v1028_v33  ;;  %v1701_v48 = vpack.c.bf16 %v995_v44, %v994_v34  ;;  %v1027_v49 = vsel %vm899_vm7, %v815_v31, %v963_v39 }
 0x13c   : > { %1810 = vst [vmem:[%s2177_s17 + $0x68] sm:$0xff] %v1706_v42   ;;  %v1781_v50 = vpack.c.bf16 %v1027_v49, %v1026_v46  ;;  %vm872_vm8 = vcmp.ge.f32.partialorder %v708_v41, 0.0  ;;  %v936_v51 = vmul.f32 0.01, %v708_v41  ;;  %v968_v52 = vmul.f32 0.01, %v836_v45 }
 0x13d   : > { %1826 = vst [vmem:[%s2177_s17 + $0xe8] sm:$0xff] %v1786_v47   ;;  %1809 = vst [vmem:[%s2177_s17 + $0x60] sm:$0xff] %v1701_v48   ;;  %v700_v53 = vadd.f32 %v2160_v40, %v699_v18  ;;  %v828_v54 = vadd.f32 %v2160_v40, %v827_v19  ;;  %v711_v55 = vadd.f32 %v1916_v22, %v2160_v40  ;;  %vm904_vm9 = vcmp.ge.f32.partialorder %v836_v45, 0.0 }
 0x13e   : > { %v839_v56 = vadd.f32 %v1948_v23, %v2160_v40  ;;  %1825 = vst [vmem:[%s2177_s17 + $0xe0] sm:$0xff] %v1781_v50   ;;  %v703_v57 = vadd.f32 %v2160_v40, %v702_v27  ;;  %v831_v58 = vadd.f32 %v2160_v40, %v830_v32  ;;  %v1000_v59 = vsel %vm872_vm8, %v708_v41, %v936_v51 }
 0x13f   : > { %vm870_vm10 = vcmp.ge.f32.partialorder %v700_v53, 0.0  ;;  %v934_v60 = vmul.f32 0.01, %v700_v53  ;;  %v966_v61 = vmul.f32 0.01, %v828_v54  ;;  %vm873_vm11 = vcmp.ge.f32.partialorder %v711_v55, 0.0 }
 0x140   : > { %v937_v62 = vmul.f32 0.01, %v711_v55  ;;  %vm905_vm12 = vcmp.ge.f32.partialorder %v839_v56, 0.0  ;;  %v969_v63 = vmul.f32 0.01, %v839_v56  ;;  %v1032_v0 = vsel %vm904_vm9, %v836_v45, %v968_v52 }
 0x141   : > { %vm902_vm13 = vcmp.ge.f32.partialorder %v828_v54, 0.0  ;;  %vm871_vm14 = vcmp.ge.f32.partialorder %v703_v57, 0.0  ;;  %v935_v1 = vmul.f32 0.01, %v703_v57  ;;  %vm903_vm15 = vcmp.ge.f32.partialorder %v831_v58, 0.0 }
 0x142   : > { %v1001_v2 = vsel %vm873_vm11, %v711_v55, %v937_v62  ;;  %v1033_v3 = vsel %vm905_vm12, %v839_v56, %v969_v63  ;;  %v967_v40 = vmul.f32 0.01, %v831_v58  ;;  %v998_v4 = vsel %vm870_vm10, %v700_v53, %v934_v60 }
 0x143   : > { %v1716_v5 = vpack.c.bf16 %v1001_v2, %v1000_v59  ;;  %v1796_v6 = vpack.c.bf16 %v1033_v3, %v1032_v0  ;;  %v999_v7 = vsel %vm871_vm14, %v703_v57, %v935_v1  ;;  %v1030_v8 = vsel %vm902_vm13, %v828_v54, %v966_v61 }
 0x144   : > { %v1711_v9 = vpack.c.bf16 %v999_v7, %v998_v4  ;;  %v1031_v10 = vsel %vm903_vm15, %v831_v58, %v967_v40 }
 0x145   : > { %1812 = vst [vmem:[%s2177_s17 + $0x78] sm:$0xff] %v1716_v5   ;;  %1828 = vst [vmem:[%s2177_s17 + $0xf8] sm:$0xff] %v1796_v6   ;;  %v1791_v11 = vpack.c.bf16 %v1031_v10, %v1030_v8 }
 0x146   : > { %1811 = vst [vmem:[%s2177_s17 + $0x70] sm:$0xff] %v1711_v9  }
 0x147   : > { %1827 = vst [vmem:[%s2177_s17 + $0xf0] sm:$0xff] %v1791_v11  }
 0x148 PF: > { %s13_s14 = sadd.s32 1, %s2051_s14   ;;  %s2287_s12 = smov %s2047_s13 }
 0x149   : > { %p10_p5 = scmp.ge.s32.totalorder %s13_s14, 7   ;;  %s2288_s13 = smov %s2290_s15 }
 0x14b   :  { %12 = sbr.rel (!%p10_p5) target bundleno = 2 (0x2), region = 68 }

// kernel: powerpoint_detector_forward.5
= control target key start
LH: loop header
LB: loop body
LE: loop exit
PB: predicated region body
PF: predicated region fallthrough
CT: control target
= control target key end

     0   :  { %s2585_s12 = smov 0   ;;  %s2587_s13 = smov 0   ;;  %s2927_s0 = inlined_call_operand.vmem [shape: bf16[8704,128], index: 0, kind: input, shape index: {}]   ;;  %s2928_s1 = inlined_call_operand.vmem [shape: bf16[128,128], index: 1, kind: input, shape index: {}]   ;;  %s2929_s2 = inlined_call_operand.vmem [shape: f32[1,128], index: 2, kind: input, shape index: {}]   ;;  %s2930_s3 = inlined_call_operand.vmem [shape: bf16[8704,128], index: 3, kind: output, shape index: {}]  }
   0x1   :  { %s2589_s14 = smov 0  }
   0x2 LB: > { %s25_s15 = sadd.s32 1, %s2559_s13  ;;  %p1654_p0 = scmp.ge.s32.totalorder %s2563_s14, 1  ;;  %s2563_s14 = sphi %s2589_s14, %s13_s14   ;;  %s2559_s13 = sphi %s2587_s13, %s2932_s13   ;;  %s2555_s12 = sphi %s2585_s12, %s2931_s12  }
   0x3   : > { %p27_p1 = scmp.ge.s32.totalorder %s25_s15, 17  ;;  %p169_p2 = scmp.lt.s32.totalorder %s2563_s14, 18 }
   0x5   : > { %s2934_s15 = smov (%p27_p1, %s25_s15), 0  ;;  %p170_p3 = pnand %p1654_p0, %p169_p2 }
   0x6   : > { %v2245_v0 = vld [vmem:[%s2928_s1] sm:$0xff] (!%p170_p3)   ;;  %s1655_s18 = sshll.u32 (!%p170_p3), %s2555_s12, 6  ;;  %v2246_v1 = vld [vmem:[%s2928_s1 + $0x8] sm:$0xff] (!%p170_p3)   ;;  %v2247_v2 = vld [vmem:[%s2928_s1 + $0x10] sm:$0xff] (!%p170_p3)  }
   0x7   : > { %173 = sbr.rel (%p170_p3) target bundleno = 399 (0x18f), region = 32  ;;  %p204_p4 = scmp.lt.s32.totalorder (!%p170_p3), %s1655_s18, 1087  ;;  %2125 = vmatprep.subr.bf16.mxu0 (!%p170_p3), %v2245_v0  ;;  %2205 = vmatprep.subr.bf16.mxu1 (!%p170_p3), %v2245_v0  ;;  %v2248_v3 = vld [vmem:[%s2928_s1 + $0x18] sm:$0xff] (!%p170_p3)   ;;  %v2249_v6 = vld [vmem:[%s2928_s1 + $0x20] sm:$0xff] (!%p170_p3)   ;;  %v2250_v7 = vld [vmem:[%s2928_s1 + $0x28] sm:$0xff] (!%p170_p3)  }
   0x8   : > { %2126 = vmatpush3.bf16.msra.mxu0 (!%p170_p3), %v2245_v0  ;;  %2213 = vmatpush3.bf16.msra.mxu1 (!%p170_p3), %v2245_v0  ;;  %v2251_v8 = vld [vmem:[%s2928_s1 + $0x30] sm:$0xff] (!%p170_p3)   ;;  %v2252_v9 = vld [vmem:[%s2928_s1 + $0x38] sm:$0xff] (!%p170_p3)   ;;  %v2672_v40 = vld [vmem:[%s2929_s2] ss:$0 sm:$0xff] (!%p170_p3) }
   0x9   : > { %2127 = vmatprep.subr.bf16.mxu0 (!%p170_p3), %v2246_v1  ;;  %2206 = vmatprep.subr.bf16.mxu1 (!%p170_p3), %v2246_v1 }
   0xc   : > { %2128 = vmatpush3.bf16.msra.mxu0 (!%p170_p3), %v2246_v1  ;;  %2214 = vmatpush3.bf16.msra.mxu1 (!%p170_p3), %v2246_v1 }
   0xd   : > { %2129 = vmatprep.subr.bf16.mxu0 (!%p170_p3), %v2247_v2  ;;  %2207 = vmatprep.subr.bf16.mxu1 (!%p170_p3), %v2247_v2 }
   0xe   : > { %s2936_s18 = smov (!%p204_p4, %s1655_s18), 1087 }
   0xf   : > { %s1656_s23 = sshll.u32 %s2936_s18, 2 }
  0x10   : > { %s2620_s26 = scalar_lea.vmem %s2927_s0, %s1656_s23  ;;  %2130 = vmatpush3.bf16.msra.mxu0 %v2247_v2  ;;  %2215 = vmatpush3.bf16.msra.mxu1 %v2247_v2  ;;  %s2715_s17 = scalar_lea.vmem %s2930_s3, %s1656_s23 }
  0x11   : > { %v2253_v4 = vld [vmem:[%s2620_s26] sm:$0xff]   ;;  %2131 = vmatprep.subr.bf16.mxu0 %v2248_v3  ;;  %2208 = vmatprep.subr.bf16.mxu1 %v2248_v3  ;;  %v2255_v10 = vld [vmem:[%s2620_s26 + $0x8] sm:$0xff]   ;;  %v2257_v12 = vld [vmem:[%s2620_s26 + $0x10] sm:$0xff]  }
  0x12   : > { %v2254_v5 = vld [vmem:[%s2620_s26 + $0x80] sm:$0xff]   ;;  %2141 = vmatprep.mubr.bf16.mxu0 %v2253_v4  ;;  %v2256_v11 = vld [vmem:[%s2620_s26 + $0x88] sm:$0xff]   ;;  %v2258_v13 = vld [vmem:[%s2620_s26 + $0x90] sm:$0xff]  }
  0x13   : > { %2173 = vmatprep.mubr.bf16.mxu1 %v2254_v5  ;;  %v2259_v14 = vld [vmem:[%s2620_s26 + $0x18] sm:$0xff]   ;;  %v2261_v16 = vld [vmem:[%s2620_s26 + $0x20] sm:$0xff]   ;;  %v2263_v18 = vld [vmem:[%s2620_s26 + $0x28] sm:$0xff]  }
  0x14   : > { %2132 = vmatpush3.bf16.msra.mxu0 %v2248_v3  ;;  %2216 = vmatpush3.bf16.msra.mxu1 %v2248_v3  ;;  %v2260_v15 = vld [vmem:[%s2620_s26 + $0x98] sm:$0xff]   ;;  %v2262_v17 = vld [vmem:[%s2620_s26 + $0xa0] sm:$0xff]   ;;  %v2264_v19 = vld [vmem:[%s2620_s26 + $0xa8] sm:$0xff]  }
  0x15   : > { %2133 = vmatprep.subr.bf16.mxu0 %v2249_v6  ;;  %2209 = vmatprep.subr.bf16.mxu1 %v2249_v6  ;;  %v2265_v20 = vld [vmem:[%s2620_s26 + $0x30] sm:$0xff]   ;;  %v2267_v22 = vld [vmem:[%s2620_s26 + $0x38] sm:$0xff]   ;;  %v2269_v24 = vld [vmem:[%s2620_s26 + $0x40] sm:$0xff]  }
  0x16   : > { %v2266_v21 = vld [vmem:[%s2620_s26 + $0xb0] sm:$0xff]   ;;  %v2268_v23 = vld [vmem:[%s2620_s26 + $0xb8] sm:$0xff]   ;;  %v2270_v25 = vld [vmem:[%s2620_s26 + $0xc0] sm:$0xff]  }
  0x17   : > { %v2271_v26 = vld [vmem:[%s2620_s26 + $0x48] sm:$0xff]   ;;  %v2273_v28 = vld [vmem:[%s2620_s26 + $0x50] sm:$0xff]   ;;  %v2275_v30 = vld [vmem:[%s2620_s26 + $0x58] sm:$0xff]  }
  0x18   : > { %2134 = vmatpush3.bf16.msra.mxu0 %v2249_v6  ;;  %2217 = vmatpush3.bf16.msra.mxu1 %v2249_v6  ;;  %v2272_v27 = vld [vmem:[%s2620_s26 + $0xc8] sm:$0xff]   ;;  %v2274_v29 = vld [vmem:[%s2620_s26 + $0xd0] sm:$0xff]   ;;  %v2276_v31 = vld [vmem:[%s2620_s26 + $0xd8] sm:$0xff]  }
  0x19   : > { %2135 = vmatprep.subr.bf16.mxu0 %v2250_v7  ;;  %2210 = vmatprep.subr.bf16.mxu1 %v2250_v7  ;;  %v2277_v32 = vld [vmem:[%s2620_s26 + $0x60] sm:$0xff]   ;;  %v2279_v34 = vld [vmem:[%s2620_s26 + $0x68] sm:$0xff]   ;;  %v2281_v36 = vld [vmem:[%s2620_s26 + $0x70] sm:$0xff]  }
  0x1a   : > { %v2278_v33 = vld [vmem:[%s2620_s26 + $0xe0] sm:$0xff]   ;;  %v2280_v35 = vld [vmem:[%s2620_s26 + $0xe8] sm:$0xff]   ;;  %v2282_v37 = vld [vmem:[%s2620_s26 + $0xf0] sm:$0xff]  }
  0x1b   : > { %v2283_v38 = vld [vmem:[%s2620_s26 + $0x78] sm:$0xff]  }
  0x1c   : > { %2136 = vmatpush3.bf16.msra.mxu0 %v2250_v7  ;;  %2218 = vmatpush3.bf16.msra.mxu1 %v2250_v7  ;;  %v2284_v39 = vld [vmem:[%s2620_s26 + $0xf8] sm:$0xff]  }
  0x1d   : > { %2137 = vmatprep.subr.bf16.mxu0 %v2251_v8  ;;  %2211 = vmatprep.subr.bf16.mxu1 %v2251_v8 }
  0x20   : > { %2138 = vmatpush3.bf16.msra.mxu0 %v2251_v8  ;;  %2219 = vmatpush3.bf16.msra.mxu1 %v2251_v8 }
  0x21   : > { %2139 = vmatprep.subr.bf16.mxu0 %v2252_v9  ;;  %2212 = vmatprep.subr.bf16.mxu1 %v2252_v9 }
  0x24   : > { %2140 = vmatpush3.bf16.msra.mxu0 %v2252_v9  ;;  %2220 = vmatpush3.bf16.msra.mxu1 %v2252_v9 }
  0x27   : > { %2142 = vmatmul.mubr.bf16.vlgmr.msra.gmra.mrb[0].mxu0 %v2255_v10  ;;  %2174 = vmatmul.mubr.bf16.vlgmr.msra.gmra.mrb[0].mxu1 %v2256_v11 }
  0x28   : > { %2145 = vmatprep.mubr.bf16.mxu0 %v2257_v12  ;;  %2177 = vmatprep.mubr.bf16.mxu1 %v2258_v13 }
  0x2f   : > { %2146 = vmatmul.mubr.bf16.gmra.mrb[4].mxu0 %v2259_v14  ;;  %2178 = vmatmul.mubr.bf16.gmra.mrb[4].mxu1 %v2260_v15 }
  0x30   : > { %2149 = vmatprep.mubr.bf16.mxu0 %v2261_v16  ;;  %2181 = vmatprep.mubr.bf16.mxu1 %v2262_v17 }
  0x37   : > { %2150 = vmatmul.mubr.bf16.gmra.mrb[8].mxu0 %v2263_v18  ;;  %2182 = vmatmul.mubr.bf16.gmra.mrb[8].mxu1 %v2264_v19 }
  0x38   : > { %2153 = vmatprep.mubr.bf16.mxu0 %v2265_v20  ;;  %2185 = vmatprep.mubr.bf16.mxu1 %v2266_v21 }
  0x3f   : > { %2154 = vmatmul.mubr.bf16.gmra.mrb[12].mxu0 %v2267_v22  ;;  %2186 = vmatmul.mubr.bf16.gmra.mrb[12].mxu1 %v2268_v23 }
  0x40   : > { %2157 = vmatprep.mubr.bf16.mxu0 %v2269_v24  ;;  %2189 = vmatprep.mubr.bf16.mxu1 %v2270_v25 }
  0x47   : > { %2158 = vmatmul.mubr.bf16.gmra.mrb[16].mxu0 %v2271_v26  ;;  %2190 = vmatmul.mubr.bf16.gmra.mrb[16].mxu1 %v2272_v27 }
  0x48   : > { %2161 = vmatprep.mubr.bf16.mxu0 %v2273_v28  ;;  %2193 = vmatprep.mubr.bf16.mxu1 %v2274_v29 }
  0x4f   : > { %2162 = vmatmul.mubr.bf16.gmra.mrb[20].mxu0 %v2275_v30  ;;  %2194 = vmatmul.mubr.bf16.gmra.mrb[20].mxu1 %v2276_v31 }
  0x50   : > { %2165 = vmatprep.mubr.bf16.mxu0 %v2277_v32  ;;  %2197 = vmatprep.mubr.bf16.mxu1 %v2278_v33 }
  0x57   : > { %2166 = vmatmul.mubr.bf16.gmra.mrb[24].mxu0 %v2279_v34  ;;  %2198 = vmatmul.mubr.bf16.gmra.mrb[24].mxu1 %v2280_v35 }
  0x58   : > { %2169 = vmatprep.mubr.bf16.mxu0 %v2281_v36  ;;  %2201 = vmatprep.mubr.bf16.mxu1 %v2282_v37 }
  0x5f   : > { %2170 = vmatmul.mubr.bf16.gmra.mrb[28].mxu0 %v2283_v38  ;;  %2202 = vmatmul.mubr.bf16.gmra.mrb[28].mxu1 %v2284_v39 }
  0xfa   : > { %v2143_v41 = vpop.f32.mrb[0].mxu0  ;;  %v2175_v42 = vpop.f32.mrb[0].mxu1 }
  0xfb   : > { %v596_v43 = vadd.f32 %v2143_v41, %v2672_v40  ;;  %v724_v44 = vadd.f32 %v2175_v42, %v2672_v40  ;;  %v587_v45 = vpop.f32.mrb[1].mxu0  ;;  %v715_v46 = vpop.f32.mrb[1].mxu1 }
  0xfc   : > { %v588_v47 = vadd.f32 %v2672_v40, %v587_v45  ;;  %v716_v48 = vadd.f32 %v2672_v40, %v715_v46  ;;  %v2144_v49 = vpop.f32.mrb[2].mxu0  ;;  %v2176_v50 = vpop.f32.mrb[2].mxu1 }
  0xfd   : > { %v1702_v51 = vmul.f32 -1.442695, %v596_v43  ;;  %v1734_v52 = vmul.f32 -1.442695, %v724_v44  ;;  %v599_v53 = vadd.f32 %v2144_v49, %v2672_v40  ;;  %v727_v54 = vadd.f32 %v2176_v50, %v2672_v40  ;;  %v590_v55 = vpop.f32.mrb[3].mxu0  ;;  %v718_v56 = vpop.f32.mrb[3].mxu1 }
  0xfe   : > { %v1700_v57 = vmul.f32 -1.442695, %v588_v47  ;;  %v1732_v58 = vmul.f32 -1.442695, %v716_v48  ;;  %v591_v59 = vadd.f32 %v2672_v40, %v590_v55  ;;  %v719_v60 = vadd.f32 %v2672_v40, %v718_v56 }
  0xff   : > { %2285 = vpow2.f32 %v1702_v51  ;;  %v1703_v61 = vmul.f32 -1.442695, %v599_v53  ;;  %v1735_v62 = vmul.f32 -1.442695, %v727_v54 }
 0x100   : > { %2287 = vpow2.f32 %v1734_v52  ;;  %v1701_v63 = vmul.f32 -1.442695, %v591_v59  ;;  %v1733_v0 = vmul.f32 -1.442695, %v719_v60 }
 0x101   : > { %2289 = vpow2.f32 %v1700_v57 }
 0x102   : > { %2291 = vpow2.f32 %v1732_v58  ;;  %v2147_v1 = vpop.f32.mrb[4].mxu0  ;;  %v2179_v2 = vpop.f32.mrb[4].mxu1 }
 0x103   : > { %2293 = vpow2.f32 %v1703_v61  ;;  %v612_v3 = vadd.f32 %v2147_v1, %v2672_v40  ;;  %v740_v4 = vadd.f32 %v2179_v2, %v2672_v40  ;;  %v603_v5 = vpop.f32.mrb[5].mxu0  ;;  %v731_v6 = vpop.f32.mrb[5].mxu1 }
 0x104   : > { %2295 = vpow2.f32 %v1735_v62  ;;  %v604_v7 = vadd.f32 %v2672_v40, %v603_v5  ;;  %v732_v8 = vadd.f32 %v2672_v40, %v731_v6  ;;  %v2148_v9 = vpop.f32.mrb[6].mxu0  ;;  %v2180_v10 = vpop.f32.mrb[6].mxu1 }
 0x105   : > { %2297 = vpow2.f32 %v1701_v63  ;;  %v1706_v11 = vmul.f32 -1.442695, %v612_v3  ;;  %v1738_v12 = vmul.f32 -1.442695, %v740_v4  ;;  %v615_v13 = vadd.f32 %v2148_v9, %v2672_v40  ;;  %v606_v14 = vpop.f32.mrb[7].mxu0  ;;  %v734_v15 = vpop.f32.mrb[7].mxu1 }
 0x106   : > { %2299 = vpow2.f32 %v1733_v0  ;;  %v1704_v16 = vmul.f32 -1.442695, %v604_v7  ;;  %v1736_v17 = vmul.f32 -1.442695, %v732_v8  ;;  %v743_v43 = vadd.f32 %v2180_v10, %v2672_v40 }
 0x107   : > { %2301 = vpow2.f32 %v1706_v11  ;;  %v1707_v18 = vmul.f32 -1.442695, %v615_v13  ;;  %v607_v46 = vadd.f32 %v2672_v40, %v606_v14  ;;  %v735_v52 = vadd.f32 %v2672_v40, %v734_v15 }
 0x108   : > { %2303 = vpow2.f32 %v1738_v12  ;;  %v1739_v57 = vmul.f32 -1.442695, %v743_v43 }
 0x109   : > { %v2286_v19 = vpop.eup %2285  ;;  %2305 = vpow2.f32 %v1704_v16  ;;  %v1705_v63 = vmul.f32 -1.442695, %v607_v46  ;;  %v1737_v9 = vmul.f32 -1.442695, %v735_v52 }
 0x10a   : > { %v2288_v20 = vpop.eup %2287  ;;  %v1036_v21 = vadd.f32 1.0, %v2286_v19  ;;  %2307 = vpow2.f32 %v1736_v17  ;;  %v2151_v22 = vpop.f32.mrb[8].mxu0 }
 0x10b   : > { %v2183_v23 = vpop.f32.mrb[8].mxu1  ;;  %v2290_v24 = vpop.eup %2289  ;;  %v1068_v25 = vadd.f32 1.0, %v2288_v20  ;;  %2309 = vpow2.f32 %v1707_v18  ;;  %v628_v58 = vadd.f32 %v2151_v22, %v2672_v40 }
 0x10c   : > { %v619_v26 = vpop.f32.mrb[9].mxu0  ;;  %v747_v27 = vpop.f32.mrb[9].mxu1  ;;  %2311 = vrcp.f32 %v1036_v21  ;;  %v1034_v29 = vadd.f32 1.0, %v2290_v24  ;;  %v756_v0 = vadd.f32 %v2183_v23, %v2672_v40 }
 0x10d   : > { %v2292_v28 = vpop.eup %2291  ;;  %v2152_v30 = vpop.f32.mrb[10].mxu0  ;;  %2313 = vrcp.f32 %v1068_v25  ;;  %v620_v5 = vadd.f32 %v2672_v40, %v619_v26  ;;  %v748_v6 = vadd.f32 %v2672_v40, %v747_v27  ;;  %v1710_v12 = vmul.f32 -1.442695, %v628_v58 }
 0x10e   : > { %v2184_v31 = vpop.f32.mrb[10].mxu1  ;;  %v2294_v32 = vpop.eup %2293  ;;  %v1066_v33 = vadd.f32 1.0, %v2292_v28  ;;  %2315 = vrcp.f32 %v1034_v29  ;;  %v631_v10 = vadd.f32 %v2152_v30, %v2672_v40  ;;  %v1742_v14 = vmul.f32 -1.442695, %v756_v0 }
 0x10f   : > { %v622_v34 = vpop.f32.mrb[11].mxu0  ;;  %v2296_v35 = vpop.eup %2295  ;;  %v1037_v36 = vadd.f32 1.0, %v2294_v32  ;;  %v759_v15 = vadd.f32 %v2184_v31, %v2672_v40  ;;  %v1708_v17 = vmul.f32 -1.442695, %v620_v5  ;;  %v1740_v18 = vmul.f32 -1.442695, %v748_v6 }
 0x110   : > { %v2687_v37 = vpop.f32.mrb[11].mxu1  ;;  %v2298_v38 = vpop.eup %2297  ;;  %2317 = vrcp.f32 %v1066_v33  ;;  %v1069_v39 = vadd.f32 1.0, %v2296_v35  ;;  %v623_v19 = vadd.f32 %v2672_v40, %v622_v34  ;;  %v1711_v24 = vmul.f32 -1.442695, %v631_v10 }
 0x111   : > { %v2300_v41 = vpop.eup %2299  ;;  %2319 = vrcp.f32 %v1037_v36  ;;  %v1035_v42 = vadd.f32 1.0, %v2298_v38  ;;  %v751_v25 = vadd.f32 %v2672_v40, %v2687_v37  ;;  %v1743_v36 = vmul.f32 -1.442695, %v759_v15 }
 0x112   : > { %v2302_v44 = vpop.eup %2301  ;;  %2321 = vrcp.f32 %v1069_v39  ;;  %v1067_v45 = vadd.f32 1.0, %v2300_v41  ;;  %v2155_v49 = vpop.f32.mrb[12].mxu0  ;;  %v1709_v43 = vmul.f32 -1.442695, %v623_v19 }
 0x113   : > { %v2304_v47 = vpop.eup %2303  ;;  %2323 = vrcp.f32 %v1035_v42  ;;  %v1040_v48 = vadd.f32 1.0, %v2302_v44  ;;  %v2187_v53 = vpop.f32.mrb[12].mxu1  ;;  %v644_v30 = vadd.f32 %v2155_v49, %v2672_v40 }
 0x114   : > { %v2306_v50 = vpop.eup %2305  ;;  %2325 = vrcp.f32 %v1067_v45  ;;  %v1072_v51 = vadd.f32 1.0, %v2304_v47  ;;  %v2692_v54 = vpop.f32.mrb[13].mxu0  ;;  %v772_v37 = vadd.f32 %v2187_v53, %v2672_v40  ;;  %v1741_v45 = vmul.f32 -1.442695, %v751_v25 }
 0x115   : > { %v2308_v55 = vpop.eup %2307  ;;  %2327 = vrcp.f32 %v1040_v48  ;;  %v1038_v56 = vadd.f32 1.0, %v2306_v50  ;;  %v2695_v59 = vpop.f32.mrb[13].mxu1  ;;  %v1714_v47 = vmul.f32 -1.442695, %v644_v30  ;;  %v636_v52 = vadd.f32 %v2672_v40, %v2692_v54 }
 0x116   : > { %v2697_v60 = vpop.f32.mrb[14].mxu0  ;;  %v2310_v61 = vpop.eup %2309  ;;  %2329 = vrcp.f32 %v1072_v51  ;;  %v1070_v62 = vadd.f32 1.0, %v2308_v55  ;;  %v1746_v50 = vmul.f32 -1.442695, %v772_v37  ;;  %v764_v10 = vadd.f32 %v2672_v40, %v2695_v59 }
 0x117   : > { %v2700_v1 = vpop.f32.mrb[14].mxu1  ;;  %v2702_v2 = vpop.f32.mrb[15].mxu0  ;;  %2331 = vrcp.f32 %v1038_v56  ;;  %v1041_v4 = vadd.f32 1.0, %v2310_v61 }
 0x118   : > { %v2312_v3 = vpop.eup %2311  ;;  %v2706_v7 = vpop.f32.mrb[15].mxu1  ;;  %2333 = vrcp.f32 %v1070_v62 }
 0x119   : > { %v2314_v8 = vpop.eup %2313  ;;  %2335 = vrcp.f32 %v1041_v4 }
 0x11a   : > { %v2316_v11 = vpop.eup %2315  ;;  %2337 = vpow2.f32 %v1739_v57  ;;  %v2718_v20 = vpop.f32.mrb[16].mxu0 }
 0x11b   : > { %v2318_v13 = vpop.eup %2317  ;;  %2339 = vpow2.f32 %v1705_v63  ;;  %v2720_v21 = vpop.f32.mrb[16].mxu1 }
 0x11c   : > { %v2320_v16 = vpop.eup %2319  ;;  %2341 = vpow2.f32 %v1737_v9  ;;  %v2724_v26 = vpop.f32.mrb[17].mxu0 }
 0x11d   : > { %v2322_v22 = vpop.eup %2321  ;;  %v1902_v23 = vpack.c.bf16 %v2320_v16, %v2312_v3  ;;  %v779_v27 = vpop.f32.mrb[17].mxu1  ;;  %2343 = vpow2.f32 %v1710_v12 }
 0x11e   : > { %v2324_v28 = vpop.eup %2323  ;;  %v1982_v29 = vpack.c.bf16 %v2322_v22, %v2314_v8  ;;  %v2728_v31 = vadd.f32 %v2672_v40, %v779_v27  ;;  %v2730_v32 = vpop.f32.mrb[18].mxu0  ;;  %2345 = vpow2.f32 %v1742_v14  ;;  %v2767_v14 = vmul.f32 -1.442695, %v636_v52 }
 0x11f   : > { %v2732_v33 = vpop.f32.mrb[18].mxu1  ;;  %v2326_v34 = vpop.eup %2325  ;;  %2054 = vst [vmem:[%s2715_s17 + $0x8] sm:$0xff] %v1902_v23   ;;  %v1897_v35 = vpack.c.bf16 %v2324_v28, %v2316_v11  ;;  %2347 = vpow2.f32 %v1708_v17  ;;  %v2781_v28 = vmul.f32 -1.442695, %v764_v10  ;;  %v660_v10 = vadd.f32 %v2718_v20, %v2672_v40 }
 0x120   : > { %v2736_v38 = vpop.f32.mrb[19].mxu0  ;;  %v782_v39 = vpop.f32.mrb[19].mxu1  ;;  %2070 = vst [vmem:[%s2715_s17 + $0x88] sm:$0xff] %v1982_v29   ;;  %v1977_v42 = vpack.c.bf16 %v2326_v34, %v2318_v13  ;;  %2349 = vpow2.f32 %v1740_v18  ;;  %v647_v29 = vadd.f32 %v2697_v60, %v2672_v40 }
 0x121   : > { %v2328_v41 = vpop.eup %2327  ;;  %1898 = vst [vmem:[%s2715_s17] sm:$0xff] %v1897_v35   ;;  %2351 = vpow2.f32 %v1711_v24  ;;  %v2746_v48 = vadd.f32 %v2672_v40, %v782_v39  ;;  %v775_v35 = vadd.f32 %v2700_v1, %v2672_v40 }
 0x122   : > { %v2739_v44 = vpop.eup %2329  ;;  %2069 = vst [vmem:[%s2715_s17 + $0x80] sm:$0xff] %v1977_v42   ;;  %2353 = vpow2.f32 %v1743_v36  ;;  %v2163_v53 = vpop.f32.mrb[20].mxu0  ;;  %v639_v36 = vadd.f32 %v2672_v40, %v2702_v2  ;;  %v767_v42 = vadd.f32 %v2672_v40, %v2706_v7  ;;  %v1715_v7 = vmul.f32 -1.442695, %v647_v29 }
 0x123   : > { %v2742_v46 = vpop.eup %2331  ;;  %2355 = vpow2.f32 %v1709_v43  ;;  %v2195_v55 = vpop.f32.mrb[20].mxu1  ;;  %v2753_v58 = vadd.f32 %v2163_v53, %v2672_v40  ;;  %v788_v29 = vadd.f32 %v2720_v21, %v2672_v40 }
 0x124   : > { %v2748_v49 = vpop.eup %2333  ;;  %2357 = vpow2.f32 %v1741_v45  ;;  %v2756_v61 = vadd.f32 %v2195_v55, %v2672_v40  ;;  %v667_v62 = vpop.f32.mrb[21].mxu0 }
 0x125   : > { %v2336_v51 = vpop.eup %2335  ;;  %v795_v63 = vpop.f32.mrb[21].mxu1  ;;  %2359 = vpow2.f32 %v1714_v47  ;;  %v2759_v4 = vadd.f32 %v2672_v40, %v667_v62 }
 0x126   : > { %v2338_v56 = vpop.eup %2337  ;;  %v1912_v57 = vpack.c.bf16 %v2336_v51, %v2328_v41  ;;  %v2762_v54 = vadd.f32 %v2672_v40, %v795_v63  ;;  %v2164_v5 = vpop.f32.mrb[22].mxu0  ;;  %2361 = vpow2.f32 %v1746_v50 }
 0x127   : > { %v2340_v0 = vpop.eup %2339  ;;  %v1073_v3 = vadd.f32 1.0, %v2338_v56  ;;  %v2196_v6 = vpop.f32.mrb[22].mxu1  ;;  %v2770_v18 = vadd.f32 %v2164_v5, %v2672_v40  ;;  %v1713_v5 = vmul.f32 -1.442695, %v639_v36 }
 0x128   : > { %v2342_v8 = vpop.eup %2341  ;;  %2056 = vst [vmem:[%s2715_s17 + $0x18] sm:$0xff] %v1912_v57   ;;  %v1039_v9 = vadd.f32 1.0, %v2340_v0  ;;  %v670_v11 = vpop.f32.mrb[23].mxu0  ;;  %v2773_v19 = vadd.f32 %v2196_v6, %v2672_v40 }
 0x129   : > { %v2344_v12 = vpop.eup %2343  ;;  %2363 = vrcp.f32 %v1073_v3  ;;  %v1071_v13 = vadd.f32 1.0, %v2342_v8  ;;  %v798_v15 = vpop.f32.mrb[23].mxu1  ;;  %v2776_v59 = vadd.f32 %v2672_v40, %v670_v11  ;;  %v1747_v3 = vmul.f32 -1.442695, %v775_v35 }
 0x12a   : > { %v2346_v16 = vpop.eup %2345  ;;  %2365 = vrcp.f32 %v1039_v9  ;;  %v1044_v17 = vadd.f32 1.0, %v2344_v12  ;;  %v2779_v24 = vadd.f32 %v2672_v40, %v798_v15  ;;  %v2167_v37 = vpop.f32.mrb[24].mxu0 }
 0x12b   : > { %v2348_v22 = vpop.eup %2347  ;;  %2367 = vrcp.f32 %v1071_v13  ;;  %v1076_v23 = vadd.f32 1.0, %v2346_v16  ;;  %v2792_v43 = vadd.f32 %v2167_v37, %v2672_v40  ;;  %v2199_v60 = vpop.f32.mrb[24].mxu1  ;;  %v1718_v37 = vmul.f32 -1.442695, %v660_v10 }
 0x12c   : > { %v2350_v25 = vpop.eup %2349  ;;  %2369 = vrcp.f32 %v1044_v17  ;;  %v1042_v27 = vadd.f32 1.0, %v2348_v22  ;;  %v683_v45 = vpop.f32.mrb[25].mxu0  ;;  %v2795_v1 = vadd.f32 %v2199_v60, %v2672_v40 }
 0x12d   : > { %v2352_v30 = vpop.eup %2351  ;;  %2371 = vrcp.f32 %v1076_v23  ;;  %v1074_v34 = vadd.f32 1.0, %v2350_v25  ;;  %v2798_v2 = vadd.f32 %v2672_v40, %v683_v45  ;;  %v811_v51 = vpop.f32.mrb[25].mxu1  ;;  %v1745_v23 = vmul.f32 -1.442695, %v767_v42 }
 0x12e   : > { %v2354_v39 = vpop.eup %2353  ;;  %2373 = vrcp.f32 %v1042_v27  ;;  %v1045_v41 = vadd.f32 1.0, %v2352_v30  ;;  %v2168_v52 = vpop.f32.mrb[26].mxu0  ;;  %v2801_v56 = vadd.f32 %v2672_v40, %v811_v51  ;;  %v652_v30 = vadd.f32 %v2672_v40, %v2724_v26 }
 0x12f   : > { %v2356_v47 = vpop.eup %2355  ;;  %2375 = vrcp.f32 %v1074_v34  ;;  %v1077_v50 = vadd.f32 1.0, %v2354_v39  ;;  %v2200_v57 = vpop.f32.mrb[26].mxu1  ;;  %v2806_v11 = vadd.f32 %v2168_v52, %v2672_v40 }
 0x130   : > { %v2358_v53 = vpop.eup %2357  ;;  %2377 = vrcp.f32 %v1045_v41  ;;  %v1043_v55 = vadd.f32 1.0, %v2356_v47  ;;  %v686_v62 = vpop.f32.mrb[27].mxu0  ;;  %v2809_v15 = vadd.f32 %v2200_v57, %v2672_v40  ;;  %v663_v47 = vadd.f32 %v2730_v32, %v2672_v40 }
 0x131   : > { %v2360_v63 = vpop.eup %2359  ;;  %2379 = vrcp.f32 %v1077_v50  ;;  %v1075_v0 = vadd.f32 1.0, %v2358_v53  ;;  %v814_v6 = vpop.f32.mrb[27].mxu1  ;;  %v2812_v16 = vadd.f32 %v2672_v40, %v686_v62  ;;  %v791_v57 = vadd.f32 %v2732_v33, %v2672_v40 }
 0x132   : > { %v2362_v8 = vpop.eup %2361  ;;  %2381 = vrcp.f32 %v1043_v55  ;;  %v1048_v9 = vadd.f32 1.0, %v2360_v63  ;;  %v2816_v20 = vadd.f32 %v2672_v40, %v814_v6  ;;  %v2171_v34 = vpop.f32.mrb[28].mxu0  ;;  %v1750_v55 = vmul.f32 -1.442695, %v788_v29 }
 0x133   : > { %v2364_v12 = vpop.eup %2363  ;;  %2383 = vrcp.f32 %v1075_v0  ;;  %v1080_v13 = vadd.f32 1.0, %v2362_v8  ;;  %v2203_v35 = vpop.f32.mrb[28].mxu1  ;;  %v2827_v39 = vadd.f32 %v2171_v34, %v2672_v40  ;;  %v655_v32 = vadd.f32 %v2672_v40, %v2736_v38 }
 0x134   : > { %v2366_v17 = vpop.eup %2365  ;;  %v1992_v22 = vpack.c.bf16 %v2364_v12, %v2739_v44  ;;  %2385 = vrcp.f32 %v1048_v9  ;;  %v827_v41 = vpop.f32.mrb[29].mxu1  ;;  %v2832_v21 = vadd.f32 %v2203_v35, %v2672_v40  ;;  %v1751_v12 = vmul.f32 -1.442695, %v791_v57 }
 0x135   : > { %v2368_v25 = vpop.eup %2367  ;;  %v1907_v27 = vpack.c.bf16 %v2366_v17, %v2742_v46  ;;  %2387 = vrcp.f32 %v1080_v13  ;;  %v699_v46 = vpop.f32.mrb[29].mxu0 }
 0x136   : > { %v2370_v36 = vpop.eup %2369  ;;  %2072 = vst [vmem:[%s2715_s17 + $0x98] sm:$0xff] %v1992_v22   ;;  %v1987_v44 = vpack.c.bf16 %v2368_v25, %v2748_v49  ;;  %2389 = vpow2.f32 %v2767_v14  ;;  %v2835_v26 = vadd.f32 %v2672_v40, %v699_v46  ;;  %v2838_v49 = vadd.f32 %v2672_v40, %v827_v41  ;;  %v2172_v14 = vpop.f32.mrb[30].mxu0 }
 0x137   : > { %v2372_v42 = vpop.eup %2371  ;;  %2055 = vst [vmem:[%s2715_s17 + $0x10] sm:$0xff] %v1907_v27   ;;  %2391 = vpow2.f32 %v2781_v28  ;;  %v2204_v60 = vpop.f32.mrb[30].mxu1  ;;  %v2844_v50 = vadd.f32 %v2172_v14, %v2672_v40 }
 0x138   : > { %v2374_v45 = vpop.eup %2373  ;;  %2071 = vst [vmem:[%s2715_s17 + $0x90] sm:$0xff] %v1987_v44   ;;  %2393 = vpow2.f32 %v1715_v7  ;;  %v2847_v28 = vadd.f32 %v2204_v60, %v2672_v40  ;;  %v702_v51 = vpop.f32.mrb[31].mxu0  ;;  %v1716_v7 = vmul.f32 -1.442695, %v652_v30 }
 0x139   : > { %v830_v52 = vpop.f32.mrb[31].mxu1  ;;  %v2376_v53 = vpop.eup %2375  ;;  %2395 = vpow2.f32 %v1747_v3  ;;  %v2854_v63 = vadd.f32 %v2672_v40, %v702_v51  ;;  %v1748_v3 = vmul.f32 -1.442695, %v2728_v31  ;;  %v1717_v31 = vmul.f32 -1.442695, %v655_v32 }
 0x13a   : > { %v2378_v62 = vpop.eup %2377  ;;  %2397 = vpow2.f32 %v1713_v5  ;;  %v2858_v8 = vadd.f32 %v2672_v40, %v830_v52  ;;  %v1719_v5 = vmul.f32 -1.442695, %v663_v47  ;;  %v1749_v32 = vmul.f32 -1.442695, %v2746_v48 }
 0x13b   : > { %v2380_v0 = vpop.eup %2379  ;;  %v1922_v6 = vpack.c.bf16 %v2378_v62, %v2370_v36  ;;  %2399 = vpow2.f32 %v1745_v23  ;;  %v1752_v48 = vmul.f32 -1.442695, %v2762_v54  ;;  %v1721_v54 = vmul.f32 -1.442695, %v2776_v59 }
 0x13c   : > { %v2382_v33 = vpop.eup %2381  ;;  %v2002_v9 = vpack.c.bf16 %v2380_v0, %v2372_v42  ;;  %2401 = vpow2.f32 %v1718_v37  ;;  %v1724_v59 = vmul.f32 -1.442695, %v2798_v2 }
 0x13d   : > { %v2384_v10 = vpop.eup %2383  ;;  %2058 = vst [vmem:[%s2715_s17 + $0x28] sm:$0xff] %v1922_v6   ;;  %v1917_v38 = vpack.c.bf16 %v2382_v33, %v2374_v45  ;;  %2403 = vpow2.f32 %v1750_v55 }
 0x13e   : > { %v2861_v13 = vpop.eup %2385  ;;  %2074 = vst [vmem:[%s2715_s17 + $0xa8] sm:$0xff] %v2002_v9   ;;  %v1997_v17 = vpack.c.bf16 %v2384_v10, %v2376_v53  ;;  %2405 = vpow2.f32 %v1716_v7  ;;  %v1754_v9 = vmul.f32 -1.442695, %v2756_v61  ;;  %v1720_v10 = vmul.f32 -1.442695, %v2759_v4 }
 0x13f   : > { %v2864_v22 = vpop.eup %2387  ;;  %2057 = vst [vmem:[%s2715_s17 + $0x20] sm:$0xff] %v1917_v38   ;;  %2407 = vpow2.f32 %v1748_v3  ;;  %v1722_v3 = vmul.f32 -1.442695, %v2753_v58  ;;  %v1755_v4 = vmul.f32 -1.442695, %v2773_v19 }
 0x140   : > { %v2390_v40 = vpop.eup %2389  ;;  %2073 = vst [vmem:[%s2715_s17 + $0xa0] sm:$0xff] %v1997_v17   ;;  %2409 = vpow2.f32 %v1719_v5  ;;  %v1758_v19 = vmul.f32 -1.442695, %v2795_v1 }
 0x141   : > { %v2392_v23 = vpop.eup %2391  ;;  %v1046_v25 = vadd.f32 1.0, %v2390_v40  ;;  %2411 = vpow2.f32 %v1751_v12 }
 0x142   : > { %v2394_v27 = vpop.eup %2393  ;;  %v1078_v29 = vadd.f32 1.0, %v2392_v23  ;;  %2413 = vpow2.f32 %v1717_v31  ;;  %v1723_v31 = vmul.f32 -1.442695, %v2770_v18  ;;  %v1726_v18 = vmul.f32 -1.442695, %v2792_v43 }
 0x143   : > { %v2396_v30 = vpop.eup %2395  ;;  %2415 = vrcp.f32 %v1046_v25  ;;  %v1049_v34 = vadd.f32 1.0, %v2394_v27 }
 0x144   : > { %v2398_v35 = vpop.eup %2397  ;;  %2417 = vrcp.f32 %v1078_v29  ;;  %v1081_v36 = vadd.f32 1.0, %v2396_v30 }
 0x145   : > { %v2400_v44 = vpop.eup %2399  ;;  %2419 = vrcp.f32 %v1049_v34  ;;  %v1047_v37 = vadd.f32 1.0, %v2398_v35 }
 0x146   : > { %v2402_v46 = vpop.eup %2401  ;;  %2421 = vrcp.f32 %v1081_v36  ;;  %v1079_v41 = vadd.f32 1.0, %v2400_v44 }
 0x147   : > { %v2404_v42 = vpop.eup %2403  ;;  %2423 = vrcp.f32 %v1047_v37  ;;  %v1052_v14 = vadd.f32 1.0, %v2402_v46 }
 0x148   : > { %v2406_v60 = vpop.eup %2405  ;;  %2425 = vrcp.f32 %v1079_v41  ;;  %v1084_v45 = vadd.f32 1.0, %v2404_v42 }
 0x149   : > { %v2408_v47 = vpop.eup %2407  ;;  %2427 = vrcp.f32 %v1052_v14  ;;  %v1050_v51 = vadd.f32 1.0, %v2406_v60 }
 0x14a   : > { %v2410_v52 = vpop.eup %2409  ;;  %2429 = vrcp.f32 %v1084_v45  ;;  %v1082_v53 = vadd.f32 1.0, %v2408_v47 }
 0x14b   : > { %v2412_v55 = vpop.eup %2411  ;;  %2431 = vrcp.f32 %v1050_v51  ;;  %v1053_v57 = vadd.f32 1.0, %v2410_v52 }
 0x14c   : > { %v2414_v62 = vpop.eup %2413  ;;  %2433 = vrcp.f32 %v1082_v53  ;;  %v1085_v7 = vadd.f32 1.0, %v2412_v55 }
 0x14d   : > { %v2416_v0 = vpop.eup %2415  ;;  %2435 = vrcp.f32 %v1053_v57  ;;  %v1051_v6 = vadd.f32 1.0, %v2414_v62 }
 0x14e   : > { %v2418_v33 = vpop.eup %2417  ;;  %2437 = vrcp.f32 %v1085_v7 }
 0x14f   : > { %v2420_v5 = vpop.eup %2419  ;;  %2439 = vrcp.f32 %v1051_v6 }
 0x150   : > { %v2422_v38 = vpop.eup %2421  ;;  %v1932_v12 = vpack.c.bf16 %v2420_v5, %v2861_v13  ;;  %2441 = vpow2.f32 %v1749_v32 }
 0x151   : > { %v2424_v17 = vpop.eup %2423  ;;  %v2012_v58 = vpack.c.bf16 %v2422_v38, %v2864_v22  ;;  %2443 = vpow2.f32 %v1722_v3  ;;  %v1753_v22 = vmul.f32 -1.442695, %v2779_v24  ;;  %v1756_v24 = vmul.f32 -1.442695, %v2801_v56 }
 0x152   : > { %v2426_v61 = vpop.eup %2425  ;;  %2060 = vst [vmem:[%s2715_s17 + $0x38] sm:$0xff] %v1932_v12   ;;  %v1927_v40 = vpack.c.bf16 %v2424_v17, %v2416_v0  ;;  %2445 = vpow2.f32 %v1754_v9  ;;  %v1759_v12 = vmul.f32 -1.442695, %v2809_v15  ;;  %v1762_v15 = vmul.f32 -1.442695, %v2832_v21 }
 0x153   : > { %v2428_v23 = vpop.eup %2427  ;;  %2076 = vst [vmem:[%s2715_s17 + $0xb8] sm:$0xff] %v2012_v58   ;;  %v2007_v13 = vpack.c.bf16 %v2426_v61, %v2418_v33  ;;  %2447 = vpow2.f32 %v1720_v10  ;;  %v1727_v10 = vmul.f32 -1.442695, %v2806_v11  ;;  %v1725_v58 = vmul.f32 -1.442695, %v2812_v16 }
 0x154   : > { %v2430_v25 = vpop.eup %2429  ;;  %2059 = vst [vmem:[%s2715_s17 + $0x30] sm:$0xff] %v1927_v40   ;;  %2449 = vpow2.f32 %v1752_v48  ;;  %v1757_v61 = vmul.f32 -1.442695, %v2816_v20  ;;  %v1760_v20 = vmul.f32 -1.442695, %v2838_v49 }
 0x155   : > { %v2432_v27 = vpop.eup %2431  ;;  %2075 = vst [vmem:[%s2715_s17 + $0xb0] sm:$0xff] %v2007_v13   ;;  %2451 = vpow2.f32 %v1723_v31  ;;  %v1728_v13 = vmul.f32 -1.442695, %v2835_v26  ;;  %v1761_v49 = vmul.f32 -1.442695, %v2858_v8 }
 0x156   : > { %v2884_v29 = vpop.eup %2433  ;;  %2453 = vpow2.f32 %v1755_v4  ;;  %v1730_v4 = vmul.f32 -1.442695, %v2827_v39  ;;  %v1731_v39 = vmul.f32 -1.442695, %v2844_v50 }
 0x157   : > { %v2436_v30 = vpop.eup %2435  ;;  %2455 = vpow2.f32 %v1721_v54 }
 0x158   : > { %v2438_v34 = vpop.eup %2437  ;;  %v1942_v35 = vpack.c.bf16 %v2436_v30, %v2428_v23  ;;  %2457 = vpow2.f32 %v1753_v22 }
 0x159   : > { %v2440_v36 = vpop.eup %2439  ;;  %v2022_v44 = vpack.c.bf16 %v2438_v34, %v2430_v25  ;;  %2459 = vpow2.f32 %v1726_v18  ;;  %v1763_v18 = vmul.f32 -1.442695, %v2847_v28 }
 0x15a   : > { %v2442_v43 = vpop.eup %2441  ;;  %2062 = vst [vmem:[%s2715_s17 + $0x48] sm:$0xff] %v1942_v35   ;;  %v1937_v37 = vpack.c.bf16 %v2440_v36, %v2432_v27  ;;  %2461 = vpow2.f32 %v1758_v19 }
 0x15b   : > { %v2444_v46 = vpop.eup %2443  ;;  %2078 = vst [vmem:[%s2715_s17 + $0xc8] sm:$0xff] %v2022_v44   ;;  %v1083_v1 = vadd.f32 1.0, %v2442_v43  ;;  %2463 = vpow2.f32 %v1724_v59 }
 0x15c   : > { %v2446_v41 = vpop.eup %2445  ;;  %2061 = vst [vmem:[%s2715_s17 + $0x40] sm:$0xff] %v1937_v37   ;;  %v1056_v2 = vadd.f32 1.0, %v2444_v46  ;;  %2465 = vpow2.f32 %v1756_v24 }
 0x15d   : > { %v2448_v42 = vpop.eup %2447  ;;  %2467 = vrcp.f32 %v1083_v1  ;;  %v1088_v14 = vadd.f32 1.0, %v2446_v41 }
 0x15e   : > { %v2450_v60 = vpop.eup %2449  ;;  %2469 = vrcp.f32 %v1056_v2  ;;  %v1054_v56 = vadd.f32 1.0, %v2448_v42 }
 0x15f   : > { %v2452_v45 = vpop.eup %2451  ;;  %2471 = vrcp.f32 %v1088_v14  ;;  %v1086_v47 = vadd.f32 1.0, %v2450_v60 }
 0x160   : > { %v2454_v51 = vpop.eup %2453  ;;  %2473 = vrcp.f32 %v1054_v56  ;;  %v1057_v52 = vadd.f32 1.0, %v2452_v45 }
 0x161   : > { %v2456_v53 = vpop.eup %2455  ;;  %2475 = vrcp.f32 %v1086_v47  ;;  %v1089_v55 = vadd.f32 1.0, %v2454_v51 }
 0x162   : > { %v2458_v57 = vpop.eup %2457  ;;  %2477 = vrcp.f32 %v1057_v52  ;;  %v1055_v62 = vadd.f32 1.0, %v2456_v53 }
 0x163   : > { %v2460_v7 = vpop.eup %2459  ;;  %2479 = vrcp.f32 %v1089_v55  ;;  %v1087_v32 = vadd.f32 1.0, %v2458_v57 }
 0x164   : > { %v2462_v0 = vpop.eup %2461  ;;  %2481 = vrcp.f32 %v1055_v62  ;;  %v1060_v6 = vadd.f32 1.0, %v2460_v7 }
 0x165   : > { %v2464_v3 = vpop.eup %2463  ;;  %2483 = vrcp.f32 %v1087_v32  ;;  %v1092_v33 = vadd.f32 1.0, %v2462_v0 }
 0x166   : > { %v2466_v9 = vpop.eup %2465  ;;  %v1058_v5 = vadd.f32 1.0, %v2464_v3  ;;  %2485 = vrcp.f32 %v1060_v6 }
 0x167   : > { %v2468_v38 = vpop.eup %2467  ;;  %2487 = vrcp.f32 %v1092_v33  ;;  %v1090_v59 = vadd.f32 1.0, %v2466_v9 }
 0x168   : > { %v2470_v48 = vpop.eup %2469  ;;  %v2017_v17 = vpack.c.bf16 %v2468_v38, %v2884_v29  ;;  %2489 = vrcp.f32 %v1058_v5  ;;  %v1729_v29 = vmul.f32 -1.442695, %v2854_v63 }
 0x169   : > { %v2472_v31 = vpop.eup %2471  ;;  %2491 = vpow2.f32 %v1727_v10 }
 0x16a   : > { %v2474_v40 = vpop.eup %2473  ;;  %2077 = vst [vmem:[%s2715_s17 + $0xc0] sm:$0xff] %v2017_v17   ;;  %2493 = vpow2.f32 %v1759_v12 }
 0x16b   : > { %v2476_v11 = vpop.eup %2475  ;;  %2495 = vpow2.f32 %v1725_v58 }
 0x16c   : > { %v2478_v23 = vpop.eup %2477  ;;  %2497 = vpow2.f32 %v1757_v61 }
 0x16d   : > { %v2480_v16 = vpop.eup %2479  ;;  %v1952_v54 = vpack.c.bf16 %v2478_v23, %v2470_v48  ;;  %2499 = vpow2.f32 %v1730_v4 }
 0x16e   : > { %v2482_v25 = vpop.eup %2481  ;;  %v2032_v22 = vpack.c.bf16 %v2480_v16, %v2472_v31  ;;  %2501 = vpow2.f32 %v1762_v15 }
 0x16f   : > { %v2484_v27 = vpop.eup %2483  ;;  %2064 = vst [vmem:[%s2715_s17 + $0x58] sm:$0xff] %v1952_v54   ;;  %v1947_v21 = vpack.c.bf16 %v2482_v25, %v2474_v40  ;;  %2503 = vpow2.f32 %v1728_v13 }
 0x170   : > { %2080 = vst [vmem:[%s2715_s17 + $0xd8] sm:$0xff] %v2032_v22   ;;  %v2027_v26 = vpack.c.bf16 %v2484_v27, %v2476_v11  ;;  %v2486_v19 = vpop.eup %2485  ;;  %2505 = vpow2.f32 %v1760_v20 }
 0x171   : > { %2063 = vst [vmem:[%s2715_s17 + $0x50] sm:$0xff] %v1947_v21   ;;  %v2488_v30 = vpop.eup %2487  ;;  %2507 = vpow2.f32 %v1731_v39 }
 0x172   : > { %2079 = vst [vmem:[%s2715_s17 + $0xd0] sm:$0xff] %v2027_v26   ;;  %v2490_v50 = vpop.eup %2489  ;;  %2509 = vpow2.f32 %v1763_v18 }
 0x173   : > { %v2492_v34 = vpop.eup %2491  ;;  %2511 = vpow2.f32 %v1729_v29 }
 0x174   : > { %v2494_v35 = vpop.eup %2493  ;;  %v1061_v28 = vadd.f32 1.0, %v2492_v34  ;;  %2513 = vpow2.f32 %v1761_v49 }
 0x175   : > { %v2496_v24 = vpop.eup %2495  ;;  %2515 = vrcp.f32 %v1090_v59  ;;  %v1093_v36 = vadd.f32 1.0, %v2494_v35 }
 0x176   : > { %v2498_v63 = vpop.eup %2497  ;;  %2517 = vrcp.f32 %v1061_v28  ;;  %v1059_v44 = vadd.f32 1.0, %v2496_v24 }
 0x177   : > { %v2500_v43 = vpop.eup %2499  ;;  %2519 = vrcp.f32 %v1093_v36  ;;  %v1091_v8 = vadd.f32 1.0, %v2498_v63 }
 0x178   : > { %v2502_v37 = vpop.eup %2501  ;;  %2521 = vrcp.f32 %v1059_v44  ;;  %v1064_v46 = vadd.f32 1.0, %v2500_v43 }
 0x179   : > { %v2504_v1 = vpop.eup %2503  ;;  %2523 = vrcp.f32 %v1091_v8  ;;  %v1096_v41 = vadd.f32 1.0, %v2502_v37 }
 0x17a   : > { %v2506_v2 = vpop.eup %2505  ;;  %2525 = vrcp.f32 %v1064_v46  ;;  %v1062_v42 = vadd.f32 1.0, %v2504_v1 }
 0x17b   : > { %v2508_v14 = vpop.eup %2507  ;;  %2527 = vrcp.f32 %v1096_v41  ;;  %v1094_v60 = vadd.f32 1.0, %v2506_v2 }
 0x17c   : > { %v2510_v56 = vpop.eup %2509  ;;  %2529 = vrcp.f32 %v1062_v42  ;;  %v1065_v45 = vadd.f32 1.0, %v2508_v14 }
 0x17d   : > { %v2512_v47 = vpop.eup %2511  ;;  %2531 = vrcp.f32 %v1094_v60  ;;  %v1097_v51 = vadd.f32 1.0, %v2510_v56 }
 0x17e   : > { %v2514_v52 = vpop.eup %2513  ;;  %2533 = vrcp.f32 %v1065_v45  ;;  %v1063_v53 = vadd.f32 1.0, %v2512_v47 }
 0x17f   : > { %v2516_v55 = vpop.eup %2515  ;;  %2535 = vrcp.f32 %v1097_v51  ;;  %v1095_v57 = vadd.f32 1.0, %v2514_v52 }
 0x180   : > { %v2518_v62 = vpop.eup %2517  ;;  %2537 = vrcp.f32 %v1063_v53 }
 0x181   : > { %v2520_v7 = vpop.eup %2519  ;;  %v1962_v32 = vpack.c.bf16 %v2518_v62, %v2486_v19  ;;  %2539 = vrcp.f32 %v1095_v57 }
 0x182   : > { %v2522_v0 = vpop.eup %2521  ;;  %v2042_v6 = vpack.c.bf16 %v2520_v7, %v2488_v30 }
 0x183   : > { %v2524_v3 = vpop.eup %2523  ;;  %2066 = vst [vmem:[%s2715_s17 + $0x68] sm:$0xff] %v1962_v32   ;;  %v1957_v33 = vpack.c.bf16 %v2522_v0, %v2490_v50 }
 0x184   : > { %v2526_v9 = vpop.eup %2525  ;;  %2082 = vst [vmem:[%s2715_s17 + $0xe8] sm:$0xff] %v2042_v6   ;;  %v2037_v5 = vpack.c.bf16 %v2524_v3, %v2516_v55 }
 0x185   : > { %v2528_v10 = vpop.eup %2527  ;;  %2065 = vst [vmem:[%s2715_s17 + $0x60] sm:$0xff] %v1957_v33  }
 0x186   : > { %v2530_v38 = vpop.eup %2529  ;;  %2081 = vst [vmem:[%s2715_s17 + $0xe0] sm:$0xff] %v2037_v5  }
 0x187   : > { %v2532_v12 = vpop.eup %2531 }
 0x188   : > { %v2534_v48 = vpop.eup %2533 }
 0x189   : > { %v2536_v17 = vpop.eup %2535  ;;  %v1972_v58 = vpack.c.bf16 %v2534_v48, %v2526_v9 }
 0x18a   : > { %v2538_v31 = vpop.eup %2537  ;;  %v2052_v61 = vpack.c.bf16 %v2536_v17, %v2528_v10 }
 0x18b   : > { %v2540_v40 = vpop.eup %2539  ;;  %2068 = vst [vmem:[%s2715_s17 + $0x78] sm:$0xff] %v1972_v58   ;;  %v1967_v4 = vpack.c.bf16 %v2538_v31, %v2530_v38 }
 0x18c   : > { %2084 = vst [vmem:[%s2715_s17 + $0xf8] sm:$0xff] %v2052_v61   ;;  %v2047_v11 = vpack.c.bf16 %v2540_v40, %v2532_v12 }
 0x18d   : > { %2067 = vst [vmem:[%s2715_s17 + $0x70] sm:$0xff] %v1967_v4  }
 0x18e   : > { %2083 = vst [vmem:[%s2715_s17 + $0xf0] sm:$0xff] %v2047_v11  }
 0x18f PF: > { %s13_s14 = sadd.s32 1, %s2563_s14   ;;  %s2931_s12 = smov %s2559_s13 }
 0x190   : > { %p10_p5 = scmp.ge.s32.totalorder %s13_s14, 19   ;;  %s2932_s13 = smov %s2934_s15 }
 0x192   :  { %12 = sbr.rel (!%p10_p5) target bundleno = 2 (0x2), region = 68 }

</bundles_post_ra>
